<compile_context>
chip_gen: v6e
topology: v6e:2x2x1
jax: 0.10.0
libtpu: 0.0.40
codegen_flags: <defaults>
</compile_context>

<pallas_src>
import functools

import jax
import jax.numpy as jnp
from jax.experimental import pallas as pl
from jax.experimental.pallas import tpu as pltpu


# ------------------------------ helpers --------------------------------------
def _round_up(x, m):
    return (x + m - 1) // m * m


def _padded_tile_bytes(shape, dtype):
    """Rough VMEM footprint of one buffer, accounting for (8,128) tiling."""
    itemsize = jnp.dtype(dtype).itemsize
    lead = 1
    for s in shape[:-2]:
        lead *= int(s)
    return (lead * _round_up(int(shape[-2]), 8) * _round_up(int(shape[-1]), 128)
            * itemsize)


def _tpu_vmem_capacity_bytes():
    try:
        return int(pltpu.get_tpu_info().vmem_capacity_bytes)
    except Exception:
        return 128 * 2 ** 20            # conservative default (v5e/v6e)


# ----------------------------- Pallas kernel ---------------------------------
def _conv_fold_kernel(x_ref, w_ref, b_ref, o_ref, *, KH, KW, stride, tr, OW,
                      apply_relu):
    # x_ref : (1, 1, tr*stride + hh, Wp, C)  overlapping input row slab (halo baked in)
    # w_ref : (KH, KW*C, tn)                 one folded (KW*C, tn) matrix per kh tap
    # b_ref : (1, tn)                        bias (f32, zero padded)
    # o_ref : (1, tr*OW, tn)                 lane-dense output tile
    C = x_ref.shape[-1]
    M = tr * OW
    slab = x_ref.at[0, 0]                     # (rows, Wp, C) ref view, no load

    acc = None
    for kh in range(KH):
        # Build the (M, KW*C) LHS for this kh tap from KW shifted windows.
        parts = []
        for kw in range(KW):
            if stride == 1:
                win = slab[kh:kh + tr, kw:kw + OW, :]
            else:
                win = slab[pl.ds(kh, tr, stride), pl.ds(kw, OW, stride), :]
            parts.append(win.reshape(M, C))
        if KW == 1:
            lhs = parts[0]
        elif C % 128 != 0 and parts[0].dtype != jnp.float32:
            # Lane-unaligned concat of a packed dtype: do it in f32, cast back
            # for the MXU (exact for bf16).
            lhs = jnp.concatenate([p.astype(jnp.float32) for p in parts],
                                  axis=-1).astype(parts[0].dtype)
        else:
            lhs = jnp.concatenate(parts, axis=-1)          # (M, KW*C)
        part = jnp.dot(lhs, w_ref[kh], preferred_element_type=jnp.float32)
        acc = part if acc is None else acc + part

    acc = acc + b_ref[...]
    if apply_relu:
        acc = jnp.maximum(acc, 0.1 * acc)     # LeakyReLU(negative_slope=0.1)
    o_ref[0] = acc.astype(o_ref.dtype)


# ------------------------------ host wrapper ---------------------------------
@functools.partial(jax.jit,
                   static_argnames=("stride", "padding", "relu", "compute_dtype"))
def conv2d_leakyrelu(x_nchw, weight, bias, *, stride=1, padding=0, relu=True,
                     compute_dtype=jnp.float32):
    """Forward pass of the PyTorch Conv2d(+LeakyReLU) module.

    x_nchw : (N, C, H, W)        float32
    weight : (OC, IC, KH, KW)    float32
    bias   : (OC,)               float32
    returns: (N, OC, OH, OW)     float32
    """
    N, C, H, W = x_nchw.shape
    OC, IC, KH, KW = weight.shape
    assert IC == C

    # NCHW -> NHWC + spatial zero pad (module-boundary API glue).
    x = jnp.transpose(x_nchw, (0, 2, 3, 1)).astype(compute_dtype)
    if padding > 0:
        x = jnp.pad(x, ((0, 0), (padding, padding), (padding, padding), (0, 0)))
    Hp, Wp = x.shape[1], x.shape[2]
    OH = (Hp - KH) // stride + 1
    OW = (Wp - KW) // stride + 1

    vmem_cap = _tpu_vmem_capacity_bytes()

    # ---- tiling --------------------------------------------------------------
    OCp = _round_up(OC, 128)                      # lane-dense output stores
    tn = 256 if (OCp % 256 == 0 and vmem_cap >= 64 * 2 ** 20) else 128
    JT = OCp // tn

    hh = max(KH - stride, 0)                      # halo rows between row tiles
    # ~256 matmul rows keeps the f32 accumulator vreg-resident (v5e/v6e); also
    # make tr large enough that the halo is a small fraction of the slab rows.
    tr = max(1, pl.cdiv(256, OW))
    if hh > 0:
        tr = max(tr, pl.cdiv(8 * hh, max(stride, 1)))
    tr = min(tr, OH)
    while tr < OH and (tr * OW) % 8 != 0:         # unmasked sublane stores
        tr += 1
    RT = pl.cdiv(OH, tr)
    OHp = RT * tr
    SLAB = tr * stride + hh                       # rows per input slab

    # Overlapping input row slabs with the halo baked in (drops the in-kernel
    # slab copy and the separate halo input). Zero-extended rows only feed
    # output rows >= OH, which are sliced off below.
    rows_needed = (RT - 1) * tr * stride + SLAB
    if rows_needed > Hp:
        x = jnp.pad(x, ((0, 0), (0, rows_needed - Hp), (0, 0), (0, 0)))
    if RT == 1:
        x_slabs = x[:, :SLAB][:, None]                       # (N, 1, SLAB, Wp, C)
    else:
        x_slabs = jnp.stack(
            [x[:, r * tr * stride:r * tr * stride + SLAB] for r in range(RT)],
            axis=1)                                           # (N, RT, SLAB, Wp, C)

    # Weights folded over (KW, C): (OC, IC, KH, KW) -> (KH, KW*C, OCp).
    w = jnp.transpose(weight, (2, 3, 1, 0)).reshape(KH, KW * C, OC)
    w = jnp.pad(w, ((0, 0), (0, 0), (0, OCp - OC))).astype(compute_dtype)
    b = jnp.pad(bias.astype(jnp.float32), (0, OCp - OC)).reshape(1, OCp)

    kernel = functools.partial(_conv_fold_kernel, KH=KH, KW=KW, stride=stride,
                               tr=tr, OW=OW, apply_relu=relu)

    # Single-buffer the constant weight / bias blocks when their index map is
    # constant over the whole grid.
    const_kw = dict(pipeline_mode=pl.Buffered(1)) if JT == 1 else {}
    in_specs = [
        pl.BlockSpec((1, 1, SLAB, Wp, C), lambda n, r, j: (n, r, 0, 0, 0)),
        pl.BlockSpec((KH, KW * C, tn), lambda n, r, j: (0, 0, j), **const_kw),
        pl.BlockSpec((1, tn), lambda n, r, j: (0, j), **const_kw),
    ]
    out_specs = pl.BlockSpec((1, tr * OW, tn), lambda n, r, j: (n, r, j))

    # Generation-aware VMEM budget: double-buffered slabs + weights + output,
    # plus accumulator / LHS temporaries, capped well below physical VMEM
    # (128 MiB on v5e/v6e, 64 MiB on v7x).
    est = (2 * _padded_tile_bytes((SLAB, Wp, C), compute_dtype)
           + (1 if JT == 1 else 2) * _padded_tile_bytes((KH, KW * C, tn),
                                                        compute_dtype)
           + 2 * _padded_tile_bytes((1, tn), jnp.float32)
           + 2 * _padded_tile_bytes((tr * OW, tn), jnp.float32)
           + 4 * _padded_tile_bytes((tr * OW, tn), jnp.float32))
    cap = int(0.55 * vmem_cap)
    vmem_limit = int(min(max(32 * 2 ** 20, 2 * est), cap))
    vmem_limit = int(max(vmem_limit, min(int(1.5 * est), int(0.9 * vmem_cap))))

    out = pl.pallas_call(
        kernel,
        out_shape=jax.ShapeDtypeStruct((N, OHp * OW, OCp), jnp.float32),
        grid_spec=pltpu.PrefetchScalarGridSpec(
            num_scalar_prefetch=0,
            grid=(N, RT, JT),
            in_specs=in_specs,
            out_specs=out_specs,
        ),
        compiler_params=pltpu.CompilerParams(
            dimension_semantics=("parallel", "parallel", "parallel"),
            vmem_limit_bytes=vmem_limit),
    )(x_slabs, w, b)

    out = out[:, :OH * OW, :OC].reshape(N, OH, OW, OC)
    return jnp.transpose(out, (0, 3, 1, 2))       # back to NCHW (module API)


# ------------------------------ reference ------------------------------------
def conv2d_leakyrelu_ref(x, w, b, *, stride=1, padding=0, relu=True):
    out = jax.lax.conv_general_dilated(
        x, w, window_strides=(stride, stride),
        padding=[(padding, padding), (padding, padding)],
        dimension_numbers=("NCHW", "OIHW", "NCHW"))
    out = out + b.reshape(1, -1, 1, 1)
    if relu:
        out = jnp.maximum(out, 0.1 * out)
    return out


if __name__ == "__main__":
    key = jax.random.PRNGKey(0)
    k1, k2, k3 = jax.random.split(key, 3)

    # module config: Conv2d(in=4, out=8, kernel_size=3, stride=1,
    #                       relu=True, same_padding=True)
    in_channels, out_channels, kernel_size, stride = 4, 8, 3, 1
    same_padding, relu = True, True
    padding = (kernel_size - 1) // 2 if same_padding else 0

    N, H, W = 2, 16, 16
    x = jax.random.normal(k1, (N, in_channels, H, W), dtype=jnp.float32)
    weight = 0.1 * jax.random.normal(
        k2, (out_channels, in_channels, kernel_size, kernel_size),
        dtype=jnp.float32)
    bias = 0.1 * jax.random.normal(k3, (out_channels,), dtype=jnp.float32)

    ref = conv2d_leakyrelu_ref(x, weight, bias, stride=stride,
                               padding=padding, relu=relu)

    # f32 path: tight check against the XLA conv.
    out = conv2d_leakyrelu(x, weight, bias, stride=stride, padding=padding,
                           relu=relu)
    out = jax.block_until_ready(out)
    assert out.shape == ref.shape == (N, out_channels, H, W)
    assert jnp.allclose(out, ref, atol=1e-4, rtol=1e-4), \
        float(jnp.max(jnp.abs(out - ref)))

    # bf16 fast path (MXU-native on v6e/v7x): loose tolerance vs f32 reference.
    out_bf16 = conv2d_leakyrelu(x, weight, bias, stride=stride,
                                padding=padding, relu=relu,
                                compute_dtype=jnp.bfloat16)
    out_bf16 = jax.block_until_ready(out_bf16)
    assert jnp.allclose(out_bf16, ref, atol=1e-1, rtol=1e-1), \
        float(jnp.max(jnp.abs(out_bf16 - ref)))

    print("KERNEL_OK")
</pallas_src>

<mosaic_0001>
module attributes {stable_mosaic.version = 11 : i64} {
  func.func @_conv_fold_kernel(%arg0: i32, %arg1: i32, %arg2: i32, %arg3: memref<1x1x18x18x4xf32, #tpu.memory_space<vmem>>, %arg4: memref<3x12x128xf32, #tpu.memory_space<vmem>>, %arg5: memref<1x128xf32, #tpu.memory_space<vmem>>, %arg6: memref<1x256x128xf32, #tpu.memory_space<vmem>>) attributes {dimension_semantics = [#tpu.dimension_semantics<parallel>, #tpu.dimension_semantics<parallel>, #tpu.dimension_semantics<parallel>], iteration_bounds = array<i64: 2, 1, 1>, scalar_prefetch = 0 : i64, scratch_operands = 0 : i64, tpu.core_type = #tpu.core_type<tc>, window_params = [{transform_indices = @transform_0, window_bounds = array<i64: 1, 1, 18, 18, 4>}, {pipeline_mode = #tpu.pipeline_mode<synchronous>, transform_indices = @transform_1, window_bounds = array<i64: 3, 12, 128>}, {pipeline_mode = #tpu.pipeline_mode<synchronous>, transform_indices = @transform_2, window_bounds = array<i64: 1, 128>}, {transform_indices = @transform_3, window_bounds = array<i64: 1, 256, 128>}]} {
    %c0_i32 = arith.constant 0 : i32
    %c0_i32_0 = arith.constant 0 : i32
    %c0_i32_1 = arith.constant 0 : i32
    %c0_i32_2 = arith.constant 0 : i32
    %c0_i32_3 = arith.constant 0 : i32
    %0 = tpu.memref_slice %arg3[%c0_i32, %c0_i32_0, %c0_i32_1, %c0_i32_2, %c0_i32_3] : memref<1x1x18x18x4xf32, #tpu.memory_space<vmem>> -> memref<1x1x18x18x4xf32, #tpu.memory_space<vmem>>
    %1 = tpu.memref_squeeze %0 : memref<1x1x18x18x4xf32, #tpu.memory_space<vmem>> -> memref<18x18x4xf32, #tpu.memory_space<vmem>>
    %c0 = arith.constant 0 : index
    %c0_4 = arith.constant 0 : index
    %c0_5 = arith.constant 0 : index
    %2 = vector.load %1[%c0, %c0_4, %c0_5] : memref<18x18x4xf32, #tpu.memory_space<vmem>>, vector<16x16x4xf32>
    %3 = vector.shape_cast %2 : vector<16x16x4xf32> to vector<256x4xf32>
    %c0_i32_6 = arith.constant 0 : i32
    %c0_i32_7 = arith.constant 0 : i32
    %c0_i32_8 = arith.constant 0 : i32
    %c0_i32_9 = arith.constant 0 : i32
    %c0_i32_10 = arith.constant 0 : i32
    %4 = tpu.memref_slice %arg3[%c0_i32_6, %c0_i32_7, %c0_i32_8, %c0_i32_9, %c0_i32_10] : memref<1x1x18x18x4xf32, #tpu.memory_space<vmem>> -> memref<1x1x18x18x4xf32, #tpu.memory_space<vmem>>
    %5 = tpu.memref_squeeze %4 : memref<1x1x18x18x4xf32, #tpu.memory_space<vmem>> -> memref<18x18x4xf32, #tpu.memory_space<vmem>>
    %c0_11 = arith.constant 0 : index
    %c1 = arith.constant 1 : index
    %c0_12 = arith.constant 0 : index
    %6 = vector.load %5[%c0_11, %c1, %c0_12] : memref<18x18x4xf32, #tpu.memory_space<vmem>>, vector<16x16x4xf32>
    %7 = vector.shape_cast %6 : vector<16x16x4xf32> to vector<256x4xf32>
    %c0_i32_13 = arith.constant 0 : i32
    %c0_i32_14 = arith.constant 0 : i32
    %c0_i32_15 = arith.constant 0 : i32
    %c0_i32_16 = arith.constant 0 : i32
    %c0_i32_17 = arith.constant 0 : i32
    %8 = tpu.memref_slice %arg3[%c0_i32_13, %c0_i32_14, %c0_i32_15, %c0_i32_16, %c0_i32_17] : memref<1x1x18x18x4xf32, #tpu.memory_space<vmem>> -> memref<1x1x18x18x4xf32, #tpu.memory_space<vmem>>
    %9 = tpu.memref_squeeze %8 : memref<1x1x18x18x4xf32, #tpu.memory_space<vmem>> -> memref<18x18x4xf32, #tpu.memory_space<vmem>>
    %c0_18 = arith.constant 0 : index
    %c2 = arith.constant 2 : index
    %c0_19 = arith.constant 0 : index
    %10 = vector.load %9[%c0_18, %c2, %c0_19] : memref<18x18x4xf32, #tpu.memory_space<vmem>>, vector<16x16x4xf32>
    %11 = vector.shape_cast %10 : vector<16x16x4xf32> to vector<256x4xf32>
    %12 = tpu.concatenate %3, %7, %11 in 1 : vector<256x4xf32>, vector<256x4xf32>, vector<256x4xf32> -> vector<256x12xf32>
    %c0_20 = arith.constant 0 : index
    %c0_21 = arith.constant 0 : index
    %c0_22 = arith.constant 0 : index
    %13 = vector.load %arg4[%c0_20, %c0_21, %c0_22] : memref<3x12x128xf32, #tpu.memory_space<vmem>>, vector<1x12x128xf32>
    %14 = vector.shape_cast %13 : vector<1x12x128xf32> to vector<12x128xf32>
    %cst = arith.constant dense<0.000000e+00> : vector<256x128xf32>
    %15 = tpu.matmul %12, %14, %cst {dimension_numbers = #tpu.dot_dimension_numbers<[1], [0], [0], [1], [0, 0, 1, 1], [], []>} : vector<256x12xf32>, vector<12x128xf32>, vector<256x128xf32> -> vector<256x128xf32>
    %c0_i32_23 = arith.constant 0 : i32
    %c0_i32_24 = arith.constant 0 : i32
    %c0_i32_25 = arith.constant 0 : i32
    %c0_i32_26 = arith.constant 0 : i32
    %c0_i32_27 = arith.constant 0 : i32
    %16 = tpu.memref_slice %arg3[%c0_i32_23, %c0_i32_24, %c0_i32_25, %c0_i32_26, %c0_i32_27] : memref<1x1x18x18x4xf32, #tpu.memory_space<vmem>> -> memref<1x1x18x18x4xf32, #tpu.memory_space<vmem>>
    %17 = tpu.memref_squeeze %16 : memref<1x1x18x18x4xf32, #tpu.memory_space<vmem>> -> memref<18x18x4xf32, #tpu.memory_space<vmem>>
    %c1_28 = arith.constant 1 : index
    %c0_29 = arith.constant 0 : index
    %c0_30 = arith.constant 0 : index
    %18 = vector.load %17[%c1_28, %c0_29, %c0_30] : memref<18x18x4xf32, #tpu.memory_space<vmem>>, vector<16x16x4xf32>
    %19 = vector.shape_cast %18 : vector<16x16x4xf32> to vector<256x4xf32>
    %c0_i32_31 = arith.constant 0 : i32
    %c0_i32_32 = arith.constant 0 : i32
    %c0_i32_33 = arith.constant 0 : i32
    %c0_i32_34 = arith.constant 0 : i32
    %c0_i32_35 = arith.constant 0 : i32
    %20 = tpu.memref_slice %arg3[%c0_i32_31, %c0_i32_32, %c0_i32_33, %c0_i32_34, %c0_i32_35] : memref<1x1x18x18x4xf32, #tpu.memory_space<vmem>> -> memref<1x1x18x18x4xf32, #tpu.memory_space<vmem>>
    %21 = tpu.memref_squeeze %20 : memref<1x1x18x18x4xf32, #tpu.memory_space<vmem>> -> memref<18x18x4xf32, #tpu.memory_space<vmem>>
    %c1_36 = arith.constant 1 : index
    %c1_37 = arith.constant 1 : index
    %c0_38 = arith.constant 0 : index
    %22 = vector.load %21[%c1_36, %c1_37, %c0_38] : memref<18x18x4xf32, #tpu.memory_space<vmem>>, vector<16x16x4xf32>
    %23 = vector.shape_cast %22 : vector<16x16x4xf32> to vector<256x4xf32>
    %c0_i32_39 = arith.constant 0 : i32
    %c0_i32_40 = arith.constant 0 : i32
    %c0_i32_41 = arith.constant 0 : i32
    %c0_i32_42 = arith.constant 0 : i32
    %c0_i32_43 = arith.constant 0 : i32
    %24 = tpu.memref_slice %arg3[%c0_i32_39, %c0_i32_40, %c0_i32_41, %c0_i32_42, %c0_i32_43] : memref<1x1x18x18x4xf32, #tpu.memory_space<vmem>> -> memref<1x1x18x18x4xf32, #tpu.memory_space<vmem>>
    %25 = tpu.memref_squeeze %24 : memref<1x1x18x18x4xf32, #tpu.memory_space<vmem>> -> memref<18x18x4xf32, #tpu.memory_space<vmem>>
    %c1_44 = arith.constant 1 : index
    %c2_45 = arith.constant 2 : index
    %c0_46 = arith.constant 0 : index
    %26 = vector.load %25[%c1_44, %c2_45, %c0_46] : memref<18x18x4xf32, #tpu.memory_space<vmem>>, vector<16x16x4xf32>
    %27 = vector.shape_cast %26 : vector<16x16x4xf32> to vector<256x4xf32>
    %28 = tpu.concatenate %19, %23, %27 in 1 : vector<256x4xf32>, vector<256x4xf32>, vector<256x4xf32> -> vector<256x12xf32>
    %c1_47 = arith.constant 1 : index
    %c0_48 = arith.constant 0 : index
    %c0_49 = arith.constant 0 : index
    %29 = vector.load %arg4[%c1_47, %c0_48, %c0_49] : memref<3x12x128xf32, #tpu.memory_space<vmem>>, vector<1x12x128xf32>
    %30 = vector.shape_cast %29 : vector<1x12x128xf32> to vector<12x128xf32>
    %cst_50 = arith.constant dense<0.000000e+00> : vector<256x128xf32>
    %31 = tpu.matmul %28, %30, %cst_50 {dimension_numbers = #tpu.dot_dimension_numbers<[1], [0], [0], [1], [0, 0, 1, 1], [], []>} : vector<256x12xf32>, vector<12x128xf32>, vector<256x128xf32> -> vector<256x128xf32>
    %32 = arith.addf %15, %31 : vector<256x128xf32>
    %c0_i32_51 = arith.constant 0 : i32
    %c0_i32_52 = arith.constant 0 : i32
    %c0_i32_53 = arith.constant 0 : i32
    %c0_i32_54 = arith.constant 0 : i32
    %c0_i32_55 = arith.constant 0 : i32
    %33 = tpu.memref_slice %arg3[%c0_i32_51, %c0_i32_52, %c0_i32_53, %c0_i32_54, %c0_i32_55] : memref<1x1x18x18x4xf32, #tpu.memory_space<vmem>> -> memref<1x1x18x18x4xf32, #tpu.memory_space<vmem>>
    %34 = tpu.memref_squeeze %33 : memref<1x1x18x18x4xf32, #tpu.memory_space<vmem>> -> memref<18x18x4xf32, #tpu.memory_space<vmem>>
    %c2_56 = arith.constant 2 : index
    %c0_57 = arith.constant 0 : index
    %c0_58 = arith.constant 0 : index
    %35 = vector.load %34[%c2_56, %c0_57, %c0_58] : memref<18x18x4xf32, #tpu.memory_space<vmem>>, vector<16x16x4xf32>
    %36 = vector.shape_cast %35 : vector<16x16x4xf32> to vector<256x4xf32>
    %c0_i32_59 = arith.constant 0 : i32
    %c0_i32_60 = arith.constant 0 : i32
    %c0_i32_61 = arith.constant 0 : i32
    %c0_i32_62 = arith.constant 0 : i32
    %c0_i32_63 = arith.constant 0 : i32
    %37 = tpu.memref_slice %arg3[%c0_i32_59, %c0_i32_60, %c0_i32_61, %c0_i32_62, %c0_i32_63] : memref<1x1x18x18x4xf32, #tpu.memory_space<vmem>> -> memref<1x1x18x18x4xf32, #tpu.memory_space<vmem>>
    %38 = tpu.memref_squeeze %37 : memref<1x1x18x18x4xf32, #tpu.memory_space<vmem>> -> memref<18x18x4xf32, #tpu.memory_space<vmem>>
    %c2_64 = arith.constant 2 : index
    %c1_65 = arith.constant 1 : index
    %c0_66 = arith.constant 0 : index
    %39 = vector.load %38[%c2_64, %c1_65, %c0_66] : memref<18x18x4xf32, #tpu.memory_space<vmem>>, vector<16x16x4xf32>
    %40 = vector.shape_cast %39 : vector<16x16x4xf32> to vector<256x4xf32>
    %c0_i32_67 = arith.constant 0 : i32
    %c0_i32_68 = arith.constant 0 : i32
    %c0_i32_69 = arith.constant 0 : i32
    %c0_i32_70 = arith.constant 0 : i32
    %c0_i32_71 = arith.constant 0 : i32
    %41 = tpu.memref_slice %arg3[%c0_i32_67, %c0_i32_68, %c0_i32_69, %c0_i32_70, %c0_i32_71] : memref<1x1x18x18x4xf32, #tpu.memory_space<vmem>> -> memref<1x1x18x18x4xf32, #tpu.memory_space<vmem>>
    %42 = tpu.memref_squeeze %41 : memref<1x1x18x18x4xf32, #tpu.memory_space<vmem>> -> memref<18x18x4xf32, #tpu.memory_space<vmem>>
    %c2_72 = arith.constant 2 : index
    %c2_73 = arith.constant 2 : index
    %c0_74 = arith.constant 0 : index
    %43 = vector.load %42[%c2_72, %c2_73, %c0_74] : memref<18x18x4xf32, #tpu.memory_space<vmem>>, vector<16x16x4xf32>
    %44 = vector.shape_cast %43 : vector<16x16x4xf32> to vector<256x4xf32>
    %45 = tpu.concatenate %36, %40, %44 in 1 : vector<256x4xf32>, vector<256x4xf32>, vector<256x4xf32> -> vector<256x12xf32>
    %c2_75 = arith.constant 2 : index
    %c0_76 = arith.constant 0 : index
    %c0_77 = arith.constant 0 : index
    %46 = vector.load %arg4[%c2_75, %c0_76, %c0_77] : memref<3x12x128xf32, #tpu.memory_space<vmem>>, vector<1x12x128xf32>
    %47 = vector.shape_cast %46 : vector<1x12x128xf32> to vector<12x128xf32>
    %cst_78 = arith.constant dense<0.000000e+00> : vector<256x128xf32>
    %48 = tpu.matmul %45, %47, %cst_78 {dimension_numbers = #tpu.dot_dimension_numbers<[1], [0], [0], [1], [0, 0, 1, 1], [], []>} : vector<256x12xf32>, vector<12x128xf32>, vector<256x128xf32> -> vector<256x128xf32>
    %49 = arith.addf %32, %48 : vector<256x128xf32>
    %c0_79 = arith.constant 0 : index
    %c0_80 = arith.constant 0 : index
    %50 = vector.load %arg5[%c0_79, %c0_80] : memref<1x128xf32, #tpu.memory_space<vmem>>, vector<1x128xf32>
    %51 = vector.broadcast %50 : vector<1x128xf32> to vector<256x128xf32>
    %52 = arith.addf %49, %51 : vector<256x128xf32>
    %cst_81 = arith.constant 1.000000e-01 : f32
    %53 = vector.broadcast %cst_81 : f32 to vector<256x128xf32>
    %54 = arith.mulf %53, %52 : vector<256x128xf32>
    %55 = arith.maximumf %52, %54 : vector<256x128xf32>
    %c0_82 = arith.constant 0 : index
    %c0_83 = arith.constant 0 : index
    %c0_84 = arith.constant 0 : index
    %56 = vector.load %arg6[%c0_82, %c0_83, %c0_84] : memref<1x256x128xf32, #tpu.memory_space<vmem>>, vector<1x256x128xf32>
    %57 = vector.shape_cast %56 : vector<1x256x128xf32> to vector<256x128xf32>
    %58 = vector.shape_cast %55 : vector<256x128xf32> to vector<1x256x128xf32>
    tpu.vector_store %arg6[%c0_82, %c0_83, %c0_84], %58 {strides = array<i32>} : memref<1x256x128xf32, #tpu.memory_space<vmem>>, vector<1x256x128xf32>,
    return
  }
  func.func @transform_0(%arg0: i32, %arg1: i32, %arg2: i32) -> (i32, i32, i32, i32, i32) {
    %c0_i32 = arith.constant 0 : i32
    %c0_i32_0 = arith.constant 0 : i32
    %c0_i32_1 = arith.constant 0 : i32
    %c0_i32_2 = arith.constant 0 : i32
    return %arg0, %arg1, %c0_i32, %c0_i32_0, %c0_i32_1 : i32, i32, i32, i32, i32
  }
  func.func @transform_1(%arg0: i32, %arg1: i32, %arg2: i32) -> (i32, i32, i32) {
    %c0_i32 = arith.constant 0 : i32
    %c0_i32_0 = arith.constant 0 : i32
    %c0_i32_1 = arith.constant 0 : i32
    return %c0_i32, %c0_i32_0, %arg2 : i32, i32, i32
  }
  func.func @transform_2(%arg0: i32, %arg1: i32, %arg2: i32) -> (i32, i32) {
    %c0_i32 = arith.constant 0 : i32
    %c0_i32_0 = arith.constant 0 : i32
    return %c0_i32, %arg2 : i32, i32
  }
  func.func @transform_3(%arg0: i32, %arg1: i32, %arg2: i32) -> (i32, i32, i32) {
    %c0_i32 = arith.constant 0 : i32
    return %arg0, %arg1, %arg2 : i32, i32, i32
  }
}

</mosaic_0001>

<bundles_post_ra>
// kernel: conv2d_leakyrelu.1
= control target key start
LH: loop header
LB: loop body
LE: loop exit
PB: predicated region body
PF: predicated region fallthrough
CT: control target
= control target key end

     0   :  { %s3429_s12 = smov 0   ;;  %s3431_s13 = smov 0   ;;  %s4614_s0 = inlined_call_operand.vmem [shape: f32[2,1,18,18,4], index: 0, kind: input, shape index: {}]   ;;  %s4615_s1 = inlined_call_operand.vmem [shape: f32[3,12,128], index: 1, kind: input, shape index: {}]   ;;  %s4616_s2 = inlined_call_operand.vmem [shape: f32[1,128], index: 2, kind: input, shape index: {}]   ;;  %s4617_s3 = inlined_call_operand.vmem [shape: f32[2,256,128], index: 3, kind: output, shape index: {}]  }
   0x1   :  { %s3433_s14 = smov 0  }
   0x2 LB: > { %s32_s15 = sadd.s32 1, %s3401_s13  ;;  %p2791_p0 = scmp.ge.s32.totalorder %s3405_s14, 1  ;;  %s3405_s14 = sphi %s3433_s14, %s13_s14   ;;  %s3401_s13 = sphi %s3431_s13, %s4627_s13   ;;  %s3397_s12 = sphi %s3429_s12, %s4626_s12  }
   0x3   : > { %p34_p1 = scmp.ge.s32.totalorder %s32_s15, 2  ;;  %p183_p2 = scmp.lt.s32.totalorder %s3405_s14, 3 }
   0x5   : > { %s4629_s15 = smov (%p34_p1, %s32_s15), 0  ;;  %p184_p3 = pnand %p2791_p0, %p183_p2 }
   0x7   : > { %187 = sbr.rel (%p184_p3) target bundleno = 721 (0x2d1), region = 32 }
   0xc   : > { %p225_p4 = scmp.lt.s32.totalorder %s3397_s12, 1  ;;  %s3407_s20 = smov 4   ;;  %vm1191_vm0 = vcmask 1043456   ;;  %v2892_v16 = vld [vmem:[%s4615_s1 + $0x18] sm:$0xf]  ;;  %v2891_v17 = vld [vmem:[%s4615_s1 + $0x10] sm:$0xff] }
   0xd   : > { %3352 = vmatprep.subr.msk.mxu1 %vm1191_vm0, %v2892_v16  ;;  %3196 = vmatprep.subr.msk.mxu0 %vm1191_vm0, %v2892_v16  ;;  %s3408_s25 = smov 8   ;;  %vm639_vm1 = vcmask 64512   ;;  %vm606_vm2 = vcmask 31744   ;;  %vm1094_vm3 = vcmask 97280  }
   0xe   : > { %s4631_s12 = smov (!%p225_p4, %s3397_s12), 1  ;;  %3354 = vmatpush3.msk.msra.mxu1 %vm1191_vm0, %v2892_v16  ;;  %3197 = vmatpush3.msk.msra.mxu0 %vm1191_vm0, %v2892_v16 }
   0xf   : > { %s3356_s16 = smul.u32 432, %s4631_s12  ;;  %3353 = vmatprep.subr.mxu1 %v2891_v17  ;;  %3198 = vmatprep.subr.mxu0 %v2891_v17  ;;  %s3093_s9 = sshll.u32 %s4631_s12, 8 }
  0x10   : > { %3355 = vmatpush3.msra.mxu1 %v2891_v17  ;;  %3199 = vmatpush3.msra.mxu0 %v2891_v17 }
  0x11   : > { %s3453_s19 = scalar_lea.vmem %s4614_s0, %s3356_s16  ;;  %s4489_s16 = scalar_lea.vmem %s4617_s3, %s3093_s9 }
  0x12   : > { %v288_v0 = vld [vmem:[%s3453_s19 + $0x19] sm:$0xff]  ;;  %v286_v1 = vld [vmem:[%s3453_s19 + $0x1] sm:$0xff]  ;;  %v287_v3 = vld [vmem:[%s3453_s19 + $0x9] sm:$0xff] }
  0x13   : > { %386 = vrot.lane.b32.xlu1 %v288_v0, %s3407_s20  ;;  %382 = vrot.lane.b32.xlu0 %v286_v1, %s3407_s20  ;;  %v289_v2 = vld [vmem:[%s3453_s19 + $0x21] sm:$0xff]  ;;  %v3464_v4 = vld [vmem:[%s3453_s19 + $0x39] sm:$0xff] }
  0x14   : > { %v3467_v5 = vld [vmem:[%s3453_s19 + $0x31] sm:$0xff]  ;;  %v3477_v7 = vld [vmem:[%s3453_s19 + $0x49] sm:$0xff]  ;;  %v3487_v9 = vld [vmem:[%s3453_s19 + $0x61] sm:$0xff] }
  0x15   : > { %v3474_v6 = vld [vmem:[%s3453_s19 + $0x51] sm:$0xff]  ;;  %v3484_v8 = vld [vmem:[%s3453_s19 + $0x69] sm:$0xff]  ;;  %v3494_v10 = vld [vmem:[%s3453_s19 + $0x81] sm:$0xff] }
  0x16   : > { %v3497_v11 = vld [vmem:[%s3453_s19 + $0x79] sm:$0xff]  ;;  %v3507_v13 = vld [vmem:[%s3453_s19 + $0x91] sm:$0xff]  ;;  %v3517_v15 = vld [vmem:[%s3453_s19 + $0xe1] sm:$0xff] }
  0x17   : > { %388 = vrot.lane.b32.xlu1 %v289_v2, %s3407_s20  ;;  %384 = vrot.lane.b32.xlu0 %v287_v3, %s3407_s20  ;;  %v3504_v12 = vld [vmem:[%s3453_s19 + $0xd9] sm:$0xff]  ;;  %v3532_v18 = vld [vmem:[%s3453_s19 + $0xe2] sm:$0xff] }
  0x18   : > { %v3514_v14 = vld [vmem:[%s3453_s19 + $0xda] sm:$0xff]  ;;  %v3546_v20 = vld [vmem:[%s3453_s19 + $0x22] sm:$0xff]  ;;  %v3549_v21 = vld [vmem:[%s3453_s19 + $0xf1] sm:$0xff] }
  0x19   : > { %v3540_v19 = vld [vmem:[%s3453_s19 + $0x1a] sm:$0xff]  ;;  %v3556_v22 = vld [vmem:[%s3453_s19 + $0xf2] sm:$0xff]  ;;  %v3583_v27 = vld [vmem:[%s3453_s19 + $0x109] sm:$0xff] }
  0x1a   : > { %v3559_v23 = vld [vmem:[%s3453_s19 + $0xf9] sm:$0xff]  ;;  %v3590_v28 = vld [vmem:[%s3453_s19 + $0x10a] sm:$0xff]  ;;  %v2849_v33 = vld [vmem:[%s3453_s19 + $0x121] sm:$0xff] }
  0x1b   : > { %392 = vrot.lane.b32.xlu1 %v3464_v4, %s3407_s20  ;;  %390 = vrot.lane.b32.xlu0 %v3467_v5, %s3407_s20  ;;  %v3566_v24 = vld [vmem:[%s3453_s19 + $0xfa] sm:$0xff]  ;;  %v3573_v25 = vld [vmem:[%s3453_s19 + $0x32] sm:$0xff] }
  0x1c   : > { %v3580_v26 = vld [vmem:[%s3453_s19 + $0x3a] sm:$0xff]  ;;  %v3593_v29 = vld [vmem:[%s3453_s19 + $0x111] sm:$0xff]  ;;  %v2881_v34 = vld [vmem:[%s3453_s19 + $0x122] sm:$0xff] }
  0x1d   : > { %v2880_v30 = vld [vmem:[%s3453_s19 + $0x112] sm:$0xff]  ;;  %v3604_v31 = vld [vmem:[%s3453_s19 + $0x4a] sm:$0xff]  ;;  %v3626_v37 = vld [vmem:[%s3453_s19 + $0x62] sm:$0xff] }
  0x1e   : > { %v3611_v32 = vld [vmem:[%s3453_s19 + $0x52] sm:$0xff]  ;;  %v2850_v35 = vld [vmem:[%s3453_s19 + $0x129] sm:$0xff]  ;;  %v2883_v40 = vld [vmem:[%s3453_s19 + $0x13a] sm:$0xff] }
  0x1f   : > { %396 = vrot.lane.b32.xlu1 %v3474_v6, %s3407_s20  ;;  %394 = vrot.lane.b32.xlu0 %v3477_v7, %s3407_s20  ;;  %v2882_v36 = vld [vmem:[%s3453_s19 + $0x12a] sm:$0xff]  ;;  %v2851_v39 = vld [vmem:[%s3453_s19 + $0x139] sm:$0xff] }
  0x20   : > { %v3633_v38 = vld [vmem:[%s3453_s19 + $0x6a] sm:$0xff]  ;;  %v2852_v41 = vld [vmem:[%s3453_s19 + $0x141] sm:$0xff]  ;;  %v2885_v46 = vld [vmem:[%s3453_s19 + $0x152] sm:$0xff] }
  0x21   : > { %v2884_v42 = vld [vmem:[%s3453_s19 + $0x142] sm:$0xff]  ;;  %v3648_v43 = vld [vmem:[%s3453_s19 + $0x7a] sm:$0xff]  ;;  %v2853_v45 = vld [vmem:[%s3453_s19 + $0x151] sm:$0xff] }
  0x22   : > { %v3655_v44 = vld [vmem:[%s3453_s19 + $0x82] sm:$0xff]  ;;  %v2854_v47 = vld [vmem:[%s3453_s19 + $0x159] sm:$0xff]  ;;  %v2887_v57 = vld [vmem:[%s3453_s19 + $0x16a] sm:$0xff] }
  0x23   : > { %400 = vrot.lane.b32.xlu1 %v3484_v8, %s3407_s20  ;;  %398 = vrot.lane.b32.xlu0 %v3487_v9, %s3407_s20  ;;  %v2886_v48 = vld [vmem:[%s3453_s19 + $0x15a] sm:$0xff]  ;;  %v3670_v49 = vld [vmem:[%s3453_s19 + $0x92] sm:$0xff] }
  0x24   : > { %v3673_v50 = vld [vmem:[%s3453_s19 + $0x99] sm:$0xff]  ;;  %v2855_v54 = vld [vmem:[%s3453_s19 + $0x169] sm:$0xff]  ;;  %v2856_v58 = vld [vmem:[%s3453_s19 + $0x171] sm:$0xff] }
  0x25   : > { %v3684_v53 = vld [vmem:[%s3453_s19 + $0x9a] sm:$0xff]  ;;  %v2888_v61 = vld [vmem:[%s3453_s19 + $0x172] sm:$0xff]  ;;  %v3704_v62 = vld [vmem:[%s3453_s19 + $0xa9] sm:$0xff] }
  0x26   : > { %v3714_v1 = vld [vmem:[%s3453_s19 + $0xaa] sm:$0xff]  ;;  %v3728_v17 = vld [vmem:[%s3453_s19 + $0xb2] sm:$0xff] }
  0x27   : > { %404 = vrot.lane.b32.xlu1 %v3494_v10, %s3407_s20  ;;  %402 = vrot.lane.b32.xlu0 %v3497_v11, %s3407_s20 }
  0x2b   : > { %835 = vrot.lane.b32.xlu1 %v3504_v12, %s3407_s20  ;;  %406 = vrot.lane.b32.xlu0 %v3507_v13, %s3407_s20 }
  0x2f   : > { %963 = vrot.lane.b32.xlu1 %v3514_v14, %s3408_s25  ;;  %837 = vrot.lane.b32.xlu0 %v3517_v15, %s3407_s20 }
  0x33   : > { %965 = vrot.lane.b32.xlu1 %v3532_v18, %s3408_s25  ;;  %803 = vrot.lane.b32.xlu0 %v288_v0, %s3407_s20 }
  0x37   : > { %931 = vrot.lane.b32.xlu1 %v3540_v19, %s3408_s25  ;;  %805 = vrot.lane.b32.xlu0 %v289_v2, %s3407_s20  ;;  %v3717_v2 = vld [vmem:[%s3453_s19 + $0xb1] sm:$0xff] }
  0x3b   : > { %933 = vrot.lane.b32.xlu1 %v3546_v20, %s3408_s25  ;;  %839 = vrot.lane.b32.xlu0 %v3549_v21, %s3407_s20 }
  0x3f   : > { %967 = vrot.lane.b32.xlu1 %v3556_v22, %s3408_s25  ;;  %841 = vrot.lane.b32.xlu0 %v3559_v23, %s3407_s20 }
  0x43   : > { %969 = vrot.lane.b32.xlu1 %v3566_v24, %s3408_s25  ;;  %807 = vrot.lane.b32.xlu0 %v3467_v5, %s3407_s20 }
  0x47   : > { %935 = vrot.lane.b32.xlu1 %v3573_v25, %s3408_s25  ;;  %809 = vrot.lane.b32.xlu0 %v3464_v4, %s3407_s20 }
  0x4b   : > { %937 = vrot.lane.b32.xlu1 %v3580_v26, %s3408_s25  ;;  %843 = vrot.lane.b32.xlu0 %v3583_v27, %s3407_s20 }
  0x4f   : > { %971 = vrot.lane.b32.xlu1 %v3590_v28, %s3408_s25  ;;  %845 = vrot.lane.b32.xlu0 %v3593_v29, %s3407_s20 }
  0x53   : > { %973 = vrot.lane.b32.xlu1 %v2880_v30, %s3408_s25  ;;  %811 = vrot.lane.b32.xlu0 %v3477_v7, %s3407_s20  ;;  %v2857_v30 = vld [vmem:[%s3453_s19 + $0x181] sm:$0xff] }
  0x57   : > { %939 = vrot.lane.b32.xlu1 %v3604_v31, %s3408_s25  ;;  %813 = vrot.lane.b32.xlu0 %v3474_v6, %s3407_s20 }
  0x5b   : > { %941 = vrot.lane.b32.xlu1 %v3611_v32, %s3408_s25  ;;  %847 = vrot.lane.b32.xlu0 %v2849_v33, %s3407_s20 }
  0x5f   : > { %975 = vrot.lane.b32.xlu1 %v2881_v34, %s3408_s25  ;;  %849 = vrot.lane.b32.xlu0 %v2850_v35, %s3407_s20  ;;  %v2889_v35 = vld [vmem:[%s3453_s19 + $0x182] sm:$0xff] }
  0x63   : > { %977 = vrot.lane.b32.xlu1 %v2882_v36, %s3408_s25  ;;  %815 = vrot.lane.b32.xlu0 %v3487_v9, %s3407_s20  ;;  %v2858_v36 = vld [vmem:[%s3453_s19 + $0x189] sm:$0xff] }
  0x67   : > { %943 = vrot.lane.b32.xlu1 %v3626_v37, %s3408_s25  ;;  %817 = vrot.lane.b32.xlu0 %v3484_v8, %s3407_s20 }
  0x6b   : > { %945 = vrot.lane.b32.xlu1 %v3633_v38, %s3408_s25  ;;  %851 = vrot.lane.b32.xlu0 %v2851_v39, %s3407_s20 }
  0x6f   : > { %979 = vrot.lane.b32.xlu1 %v2883_v40, %s3408_s25  ;;  %853 = vrot.lane.b32.xlu0 %v2852_v41, %s3407_s20  ;;  %v2811_v41 = vld [vmem:[%s3453_s19 + $0xd8] sm:$0xff] }
  0x73   : > { %981 = vrot.lane.b32.xlu1 %v2884_v42, %s3408_s25  ;;  %819 = vrot.lane.b32.xlu0 %v3497_v11, %s3407_s20  ;;  %v673_v42 = vld [vmem:[%s4615_s1 + $0x8] sm:$0xf] }
  0x74   : > { %3248 = vmatprep.subr.msk.mxu1 %vm1191_vm0, %v673_v42 }
  0x77   : > { %947 = vrot.lane.b32.xlu1 %v3648_v43, %s3408_s25  ;;  %821 = vrot.lane.b32.xlu0 %v3494_v10, %s3407_s20 }
  0x7b   : > { %949 = vrot.lane.b32.xlu1 %v3655_v44, %s3408_s25  ;;  %855 = vrot.lane.b32.xlu0 %v2853_v45, %s3407_s20  ;;  %v2890_v45 = vld [vmem:[%s3453_s19 + $0x18a] sm:$0xff] }
  0x7f   : > { %983 = vrot.lane.b32.xlu1 %v2885_v46, %s3408_s25  ;;  %857 = vrot.lane.b32.xlu0 %v2854_v47, %s3407_s20 }
  0x83   : > { %985 = vrot.lane.b32.xlu1 %v2886_v48, %s3408_s25  ;;  %823 = vrot.lane.b32.xlu0 %v3507_v13, %s3407_s20 }
  0x85   : > { %v3675_v51 = vpop.permute.xlu1 %386  ;;  %v3677_v52 = vpop.permute.xlu0 %382 }
  0x87   : > { %951 = vrot.lane.b32.xlu1 %v3670_v49, %s3408_s25  ;;  %825 = vrot.lane.b32.xlu0 %v3673_v50, %s3407_s20 }
  0x89   : > { %v3687_v55 = vpop.permute.xlu1 %388  ;;  %v3689_v56 = vpop.permute.xlu0 %384 }
  0x8b   : > { %953 = vrot.lane.b32.xlu1 %v3684_v53, %s3408_s25  ;;  %859 = vrot.lane.b32.xlu0 %v2855_v54, %s3407_s20  ;;  %v3752_v54 = vld [vmem:[%s3453_s19 + $0xc1] sm:$0xff] }
  0x8d   : > { %v3696_v59 = vpop.permute.xlu1 %392  ;;  %v3698_v60 = vpop.permute.xlu0 %390 }
  0x8f   : > { %987 = vrot.lane.b32.xlu1 %v2887_v57, %s3408_s25  ;;  %861 = vrot.lane.b32.xlu0 %v2856_v58, %s3407_s20  ;;  %v2812_v57 = vld [vmem:[%s3453_s19 + $0xe0] sm:$0xff] }
  0x91   : > { %v3706_v63 = vpop.permute.xlu1 %396  ;;  %v3708_v0 = vpop.permute.xlu0 %394 }
  0x93   : > { %989 = vrot.lane.b32.xlu1 %v2888_v61, %s3408_s25  ;;  %827 = vrot.lane.b32.xlu0 %v3704_v62, %s3407_s20  ;;  %v3761_v61 = vld [vmem:[%s3453_s19 + $0xc2] sm:$0xff] }
  0x95   : > { %v3719_v3 = vpop.permute.xlu1 %400  ;;  %v3721_v16 = vpop.permute.xlu0 %398 }
  0x96   : > { %4618 = vst [vmem:[#allocation2_spill] sm:$0xff] %v3719_v3 }
  0x97   : > { %955 = vrot.lane.b32.xlu1 %v3714_v1, %s3408_s25  ;;  %829 = vrot.lane.b32.xlu0 %v3717_v2, %s3407_s20 }
  0x99   : > { %v3731_v33 = vpop.permute.xlu1 %404  ;;  %v3733_v34 = vpop.permute.xlu0 %402 }
  0x9a   : > { %4619 = vst [vmem:[#allocation3_spill] sm:$0xff] %v3731_v33  ;;  %4620 = vst [vmem:[#allocation4_spill] sm:$0xff] %v3733_v34  ;;  %v319_v34 = vld [vmem:[%s3453_s19 + $0xa] sm:$0xff] }
  0x9b   : > { %957 = vrot.lane.b32.xlu1 %v3728_v17, %s3408_s25  ;;  %863 = vrot.lane.b32.xlu0 %v2857_v30, %s3407_s20 }
  0x9d   : > { %v836_v39 = vpop.permute.xlu1 %835  ;;  %v3740_v40 = vpop.permute.xlu0 %406 }
  0x9e   : > { %4621 = vst [vmem:[#allocation5_spill] sm:$0xff] %v3740_v40  ;;  %v1043_v46 = vsel %vm606_vm2, %v2811_v41, %v836_v39  ;;  %v3765_v39 = vld [vmem:[%s3453_s19 + $0xc9] sm:$0xff] }
  0x9f   : > { %991 = vrot.lane.b32.xlu1 %v2889_v35, %s3408_s25  ;;  %865 = vrot.lane.b32.xlu0 %v2858_v36, %s3407_s20 }
  0xa1   : > { %v964_v47 = vpop.permute.xlu1 %963  ;;  %v838_v48 = vpop.permute.xlu0 %837 }
  0xa2   : > { %v1075_v58 = vsel %vm639_vm1, %v1043_v46, %v964_v47  ;;  %v1044_v30 = vsel %vm606_vm2, %v2812_v57, %v838_v48  ;;  %v3056_v46 = vld [vmem:[%s4615_s1 + $0x28] sm:$0xf]  ;;  %v3778_v47 = vld [vmem:[%s3453_s19 + $0x18] sm:$0xff] }
  0xa3   : > { %993 = vrot.lane.b32.xlu1 %v2890_v45, %s3408_s25  ;;  %3224 = vmatprep.mubr.msk.f32.mxu1 %vm1094_vm3, %v1075_v58  ;;  %v672_v45 = vld [vmem:[%s4615_s1] sm:$0xff] }
  0xa4   : > { %831 = vrot.lane.b32.xlu0 %v3752_v54, %s3407_s20  ;;  %v318_v48 = vld [vmem:[%s3453_s19 + $0x2] sm:$0xff]  ;;  %3300 = vmatprep.subr.msk.mxu0 %vm1191_vm0, %v3056_v46 }
  0xa5   : > { %v966_v35 = vpop.permute.xlu1 %965  ;;  %v804_v36 = vpop.permute.xlu0 %803 }
  0xa6   : > { %v1076_v41 = vsel %vm639_vm1, %v1044_v30, %v966_v35  ;;  %v1027_v57 = vsel %vm606_vm2, %v3778_v47, %v804_v36  ;;  %v3787_v35 = vld [vmem:[%s3453_s19 + $0xca] sm:$0xff] }
  0xa7   : > { %959 = vrot.lane.b32.xlu1 %v3761_v61, %s3408_s25  ;;  %3225 = vmatmul.mubr.msk.f32.vlgmr.msra.gmra.mxu1 %vm1094_vm3, %v1076_v41 }
  0xa8   : > { %833 = vrot.lane.b32.xlu0 %v3765_v39, %s3407_s20  ;;  %3249 = vmatpush3.msk.msra.mxu1 %vm1191_vm0, %v673_v42  ;;  %v3794_v42 = vld [vmem:[%s3453_s19 + $0x20] sm:$0xff] }
  0xa9   : > { %v932_v58 = vpop.permute.xlu1 %931  ;;  %v806_v30 = vpop.permute.xlu0 %805  ;;  %3250 = vmatprep.subr.mxu1 %v672_v45 }
  0xaa   : > { %v1059_v41 = vsel %vm639_vm1, %v1027_v57, %v932_v58  ;;  %3251 = vmatpush3.msra.mxu1 %v672_v45  ;;  %v1028_v36 = vsel %vm606_vm2, %v3794_v42, %v806_v30  ;;  %v2813_v57 = vld [vmem:[%s3453_s19 + $0xf0] sm:$0xff]  ;;  %v3055_v45 = vld [vmem:[%s4615_s1 + $0x20] sm:$0xff] }
  0xab   : > { %510 = vrot.lane.b32.xlu1 %v318_v48, %s3408_s25  ;;  %3200 = vmatprep.mubr.msk.f32.mxu0 %vm1094_vm3, %v1059_v41  ;;  %v2814_v41 = vld [vmem:[%s3453_s19 + $0xf8] sm:$0xff] }
  0xac   : > { %961 = vrot.lane.b32.xlu0 %v3787_v35, %s3408_s25 }
  0xad   : > { %v934_v40 = vpop.permute.xlu1 %933  ;;  %v840_v33 = vpop.permute.xlu0 %839 }
  0xae   : > { %v1060_v3 = vsel %vm639_vm1, %v1028_v36, %v934_v40  ;;  %v1045_v48 = vsel %vm606_vm2, %v2813_v57, %v840_v33 }
  0xaf   : > { %1873 = vrot.lane.b32.xlu1 %v3467_v5, %s3407_s20  ;;  %3201 = vmatmul.mubr.msk.f32.vlgmr.msra.gmra.mxu0 %vm1094_vm3, %v1060_v3 }
  0xb0   : > { %512 = vrot.lane.b32.xlu0 %v319_v34, %s3408_s25  ;;  %3301 = vmatpush3.msk.msra.mxu0 %vm1191_vm0, %v3056_v46  ;;  %v3825_v46 = vld [vmem:[%s3453_s19 + $0x30] sm:$0xff] }
  0xb1   : > { %v968_v58 = vpop.permute.xlu1 %967  ;;  %v842_v30 = vpop.permute.xlu0 %841  ;;  %3302 = vmatprep.subr.mxu0 %v3055_v45 }
  0xb2   : > { %v1077_v40 = vsel %vm639_vm1, %v1045_v48, %v968_v58  ;;  %3303 = vmatpush3.msra.mxu0 %v3055_v45  ;;  %v1046_v5 = vsel %vm606_vm2, %v2814_v41, %v842_v30  ;;  %v2815_v41 = vld [vmem:[%s3453_s19 + $0x108] sm:$0xff] }
  0xb3   : > { %2001 = vrot.lane.b32.xlu1 %v3573_v25, %s3408_s25  ;;  %3227 = vmatprep.mubr.msk.f32.mxu1 %vm1094_vm3, %v1077_v40 }
  0xb4   : > { %1875 = vrot.lane.b32.xlu0 %v3464_v4, %s3407_s20 }
  0xb5   : > { %v970_v3 = vpop.permute.xlu1 %969  ;;  %v808_v33 = vpop.permute.xlu0 %807 }
  0xb6   : > { %v1078_v34 = vsel %vm639_vm1, %v1046_v5, %v970_v3  ;;  %v1029_v4 = vsel %vm606_vm2, %v3825_v46, %v808_v33  ;;  %v2816_v33 = vld [vmem:[%s3453_s19 + $0x110] sm:$0xff] }
  0xb7   : > { %514 = vrot.lane.b32.xlu1 %v3540_v19, %s3408_s25  ;;  %3228 = vmatmul.mubr.msk.f32.gmra.mxu1 %vm1094_vm3, %v1078_v34  ;;  %v3836_v19 = vld [vmem:[%s3453_s19 + $0x38] sm:$0xff] }
  0xb8   : > { %2003 = vrot.lane.b32.xlu0 %v3580_v26, %s3408_s25 }
  0xb9   : > { %v936_v36 = vpop.permute.xlu1 %935  ;;  %v810_v57 = vpop.permute.xlu0 %809 }
  0xba   : > { %v1061_v45 = vsel %vm639_vm1, %v1029_v4, %v936_v36  ;;  %v1030_v48 = vsel %vm606_vm2, %v3836_v19, %v810_v57  ;;  %v3863_v57 = vld [vmem:[%s3453_s19 + $0x48] sm:$0xff] }
  0xbb   : > { %1877 = vrot.lane.b32.xlu1 %v3477_v7, %s3407_s20  ;;  %3203 = vmatprep.mubr.msk.f32.mxu0 %vm1094_vm3, %v1061_v45 }
  0xbc   : > { %516 = vrot.lane.b32.xlu0 %v3546_v20, %s3408_s25 }
  0xbd   : > { %v938_v58 = vpop.permute.xlu1 %937  ;;  %v844_v30 = vpop.permute.xlu0 %843 }
  0xbe   : > { %v1062_v40 = vsel %vm639_vm1, %v1030_v48, %v938_v58  ;;  %v1047_v7 = vsel %vm606_vm2, %v2815_v41, %v844_v30 }
  0xbf   : > { %2005 = vrot.lane.b32.xlu1 %v3604_v31, %s3408_s25  ;;  %3204 = vmatmul.mubr.msk.f32.gmra.mxu0 %vm1094_vm3, %v1062_v40 }
  0xc0   : > { %1879 = vrot.lane.b32.xlu0 %v3474_v6, %s3407_s20 }
  0xc1   : > { %v972_v20 = vpop.permute.xlu1 %971  ;;  %v846_v5 = vpop.permute.xlu0 %845 }
  0xc2   : > { %v1079_v3 = vsel %vm639_vm1, %v1047_v7, %v972_v20  ;;  %v1048_v34 = vsel %vm606_vm2, %v2816_v33, %v846_v5  ;;  %v2817_v7 = vld [vmem:[%s3453_s19 + $0x120] sm:$0xff]  ;;  %v2818_v33 = vld [vmem:[%s3453_s19 + $0x128] sm:$0xff] }
  0xc3   : > { %518 = vrot.lane.b32.xlu1 %v3573_v25, %s3408_s25  ;;  %3230 = vmatprep.mubr.msk.f32.mxu1 %vm1094_vm3, %v1079_v3 }
  0xc4   : > { %2007 = vrot.lane.b32.xlu0 %v3611_v32, %s3408_s25 }
  0xc5   : > { %v974_v4 = vpop.permute.xlu1 %973  ;;  %v812_v6 = vpop.permute.xlu0 %811 }
  0xc6   : > { %v1080_v36 = vsel %vm639_vm1, %v1048_v34, %v974_v4  ;;  %v1031_v25 = vsel %vm606_vm2, %v3863_v57, %v812_v6 }
  0xc7   : > { %1881 = vrot.lane.b32.xlu1 %v3487_v9, %s3407_s20  ;;  %3231 = vmatmul.mubr.msk.f32.gmra.mxu1 %vm1094_vm3, %v1080_v36  ;;  %v3874_v9 = vld [vmem:[%s3453_s19 + $0x50] sm:$0xff]  ;;  %v3901_v36 = vld [vmem:[%s3453_s19 + $0x60] sm:$0xff] }
  0xc8   : > { %520 = vrot.lane.b32.xlu0 %v3580_v26, %s3408_s25 }
  0xc9   : > { %v940_v45 = vpop.permute.xlu1 %939  ;;  %v814_v48 = vpop.permute.xlu0 %813 }
  0xca   : > { %v1063_v58 = vsel %vm639_vm1, %v1031_v25, %v940_v45  ;;  %v1032_v26 = vsel %vm606_vm2, %v3874_v9, %v814_v48  ;;  %v3912_v48 = vld [vmem:[%s3453_s19 + $0x68] sm:$0xff] }
  0xcb   : > { %2009 = vrot.lane.b32.xlu1 %v3626_v37, %s3408_s25  ;;  %3206 = vmatprep.mubr.msk.f32.mxu0 %vm1094_vm3, %v1063_v58 }
  0xcc   : > { %1883 = vrot.lane.b32.xlu0 %v3484_v8, %s3407_s20 }
  0xcd   : > { %v942_v30 = vpop.permute.xlu1 %941  ;;  %v848_v40 = vpop.permute.xlu0 %847 }
  0xce   : > { %v1064_v41 = vsel %vm639_vm1, %v1032_v26, %v942_v30  ;;  %v1049_v20 = vsel %vm606_vm2, %v2817_v7, %v848_v40  ;;  %v2819_v40 = vld [vmem:[%s3453_s19 + $0x138] sm:$0xff] }
  0xcf   : > { %522 = vrot.lane.b32.xlu1 %v3604_v31, %s3408_s25  ;;  %3207 = vmatmul.mubr.msk.f32.gmra.mxu0 %vm1094_vm3, %v1064_v41 }
  0xd0   : > { %2011 = vrot.lane.b32.xlu0 %v3633_v38, %s3408_s25 }
  0xd1   : > { %v976_v8 = vpop.permute.xlu1 %975  ;;  %v850_v5 = vpop.permute.xlu0 %849 }
  0xd2   : > { %v1081_v3 = vsel %vm639_vm1, %v1049_v20, %v976_v8  ;;  %v1050_v31 = vsel %vm606_vm2, %v2818_v33, %v850_v5  ;;  %v2820_v8 = vld [vmem:[%s3453_s19 + $0x140] sm:$0xff]  ;;  %v3939_v33 = vld [vmem:[%s3453_s19 + $0x78] sm:$0xff] }
  0xd3   : > { %1885 = vrot.lane.b32.xlu1 %v3497_v11, %s3407_s20  ;;  %3233 = vmatprep.mubr.msk.f32.mxu1 %vm1094_vm3, %v1081_v3 }
  0xd4   : > { %524 = vrot.lane.b32.xlu0 %v3611_v32, %s3408_s25 }
  0xd5   : > { %v978_v34 = vpop.permute.xlu1 %977  ;;  %v816_v4 = vpop.permute.xlu0 %815 }
  0xd6   : > { %v1082_v6 = vsel %vm639_vm1, %v1050_v31, %v978_v34  ;;  %v1033_v11 = vsel %vm606_vm2, %v3901_v36, %v816_v4 }
  0xd7   : > { %2013 = vrot.lane.b32.xlu1 %v3648_v43, %s3408_s25  ;;  %3234 = vmatmul.mubr.msk.f32.gmra.mxu1 %vm1094_vm3, %v1082_v6 }
  0xd8   : > { %1887 = vrot.lane.b32.xlu0 %v3494_v10, %s3407_s20 }
  0xd9   : > { %v944_v32 = vpop.permute.xlu1 %943  ;;  %v818_v25 = vpop.permute.xlu0 %817 }
  0xda   : > { %v1065_v45 = vsel %vm639_vm1, %v1033_v11, %v944_v32  ;;  %v1034_v10 = vsel %vm606_vm2, %v3912_v48, %v818_v25 }
  0xdb   : > { %526 = vrot.lane.b32.xlu1 %v3626_v37, %s3408_s25  ;;  %3209 = vmatprep.mubr.msk.f32.mxu0 %vm1094_vm3, %v1065_v45 }
  0xdc   : > { %2015 = vrot.lane.b32.xlu0 %v3655_v44, %s3408_s25 }
  0xdd   : > { %v946_v58 = vpop.permute.xlu1 %945  ;;  %v852_v26 = vpop.permute.xlu0 %851 }
  0xde   : > { %v1066_v30 = vsel %vm639_vm1, %v1034_v10, %v946_v58  ;;  %v1051_v37 = vsel %vm606_vm2, %v2819_v40, %v852_v26  ;;  %v2821_v10 = vld [vmem:[%s3453_s19 + $0x150] sm:$0xff]  ;;  %v2822_v40 = vld [vmem:[%s3453_s19 + $0x158] sm:$0xff] }
  0xdf   : > { %1889 = vrot.lane.b32.xlu1 %v3507_v13, %s3407_s20  ;;  %3210 = vmatmul.mubr.msk.f32.gmra.mxu0 %vm1094_vm3, %v1066_v30 }
  0xe0   : > { %528 = vrot.lane.b32.xlu0 %v3633_v38, %s3408_s25 }
  0xe1   : > { %v980_v41 = vpop.permute.xlu1 %979  ;;  %v854_v7 = vpop.permute.xlu0 %853 }
  0xe2   : > { %v1083_v20 = vsel %vm639_vm1, %v1051_v37, %v980_v41  ;;  %v1052_v13 = vsel %vm606_vm2, %v2820_v8, %v854_v7  ;;  %v3977_v8 = vld [vmem:[%s3453_s19 + $0x90] sm:$0xff] }
  0xe3   : > { %2017 = vrot.lane.b32.xlu1 %v3670_v49, %s3408_s25  ;;  %3236 = vmatprep.mubr.msk.f32.mxu1 %vm1094_vm3, %v1083_v20 }
  0xe4   : > { %1891 = vrot.lane.b32.xlu0 %v3673_v50, %s3407_s20 }
  0xe5   : > { %v982_v5 = vpop.permute.xlu1 %981  ;;  %v820_v38 = vpop.permute.xlu0 %819 }
  0xe6   : > { %v1084_v3 = vsel %vm639_vm1, %v1052_v13, %v982_v5  ;;  %v1035_v31 = vsel %vm606_vm2, %v3939_v33, %v820_v38 }
  0xe7   : > { %530 = vrot.lane.b32.xlu1 %v3648_v43, %s3408_s25  ;;  %3237 = vmatmul.mubr.msk.f32.gmra.mxu1 %vm1094_vm3, %v1084_v3  ;;  %v3950_v43 = vld [vmem:[%s3453_s19 + $0x80] sm:$0xff]  ;;  %v3985_v3 = vld [vmem:[%s3453_s19 + $0x98] sm:$0xff] }
  0xe8   : > { %2019 = vrot.lane.b32.xlu0 %v3684_v53, %s3408_s25 }
  0xe9   : > { %v948_v34 = vpop.permute.xlu1 %947  ;;  %v822_v4 = vpop.permute.xlu0 %821 }
  0xea   : > { %v1067_v6 = vsel %vm639_vm1, %v1035_v31, %v948_v34  ;;  %v1036_v11 = vsel %vm606_vm2, %v3950_v43, %v822_v4  ;;  %v2823_v4 = vld [vmem:[%s3453_s19 + $0x168] sm:$0xff] }
  0xeb   : > { %1893 = vrot.lane.b32.xlu1 %v3704_v62, %s3407_s20  ;;  %3212 = vmatprep.mubr.msk.f32.mxu0 %vm1094_vm3, %v1067_v6 }
  0xec   : > { %532 = vrot.lane.b32.xlu0 %v3655_v44, %s3408_s25 }
  0xed   : > { %v950_v32 = vpop.permute.xlu1 %949  ;;  %v856_v25 = vpop.permute.xlu0 %855 }
  0xee   : > { %v1068_v45 = vsel %vm639_vm1, %v1036_v11, %v950_v32  ;;  %v1053_v58 = vsel %vm606_vm2, %v2821_v10, %v856_v25 }
  0xef   : > { %2021 = vrot.lane.b32.xlu1 %v3714_v1, %s3408_s25  ;;  %3213 = vmatmul.mubr.msk.f32.gmra.mxu0 %vm1094_vm3, %v1068_v45  ;;  %v2824_v45 = vld [vmem:[%s3453_s19 + $0x170] sm:$0xff] }
  0xf0   : > { %1895 = vrot.lane.b32.xlu0 %v3717_v2, %s3407_s20 }
  0xf1   : > { %v984_v44 = vpop.permute.xlu1 %983  ;;  %v858_v26 = vpop.permute.xlu0 %857 }
  0xf2   : > { %v1085_v30 = vsel %vm639_vm1, %v1053_v58, %v984_v44  ;;  %v1054_v37 = vsel %vm606_vm2, %v2822_v40, %v858_v26  ;;  %v4012_v26 = vld [vmem:[%s3453_s19 + $0xa8] sm:$0xff] }
  0xf3   : > { %408 = vrot.lane.b32.xlu1 %v3673_v50, %s3407_s20  ;;  %3239 = vmatprep.mubr.msk.f32.mxu1 %vm1094_vm3, %v1085_v30 }
  0xf4   : > { %2023 = vrot.lane.b32.xlu0 %v3728_v17, %s3408_s25 }
  0xf5   : > { %v986_v41 = vpop.permute.xlu1 %985  ;;  %v824_v7 = vpop.permute.xlu0 %823 }
  0xf6   : > { %v1086_v20 = vsel %vm639_vm1, %v1054_v37, %v986_v41  ;;  %v1037_v50 = vsel %vm606_vm2, %v3977_v8, %v824_v7  ;;  %v4023_v41 = vld [vmem:[%s3453_s19 + $0xb0] sm:$0xff] }
  0xf7   : > { %536 = vrot.lane.b32.xlu1 %v3684_v53, %s3408_s25  ;;  %3240 = vmatmul.mubr.msk.f32.gmra.mxu1 %vm1094_vm3, %v1086_v20 }
  0xf8   : > { %534 = vrot.lane.b32.xlu0 %v3670_v49, %s3408_s25 }
  0xf9   : > { %v952_v13 = vpop.permute.xlu1 %951  ;;  %v826_v5 = vpop.permute.xlu0 %825 }
  0xfa   : > { %v1069_v38 = vsel %vm639_vm1, %v1037_v50, %v952_v13  ;;  %v1038_v49 = vsel %vm606_vm2, %v3985_v3, %v826_v5  ;;  %v2825_v50 = vld [vmem:[%s3453_s19 + $0x180] sm:$0xff] }
  0xfb   : > { %1899 = vrot.lane.b32.xlu1 %v3765_v39, %s3407_s20  ;;  %3215 = vmatprep.mubr.msk.f32.mxu0 %vm1094_vm3, %v1069_v38 }
  0xfc   : > { %1897 = vrot.lane.b32.xlu0 %v3752_v54, %s3407_s20 }
  0xfd   : > { %v954_v53 = vpop.permute.xlu1 %953  ;;  %v860_v31 = vpop.permute.xlu0 %859 }
  0xfe   : > { %v1070_v34 = vsel %vm639_vm1, %v1038_v49, %v954_v53  ;;  %v1055_v6 = vsel %vm606_vm2, %v2823_v4, %v860_v31  ;;  %v2826_v53 = vld [vmem:[%s3453_s19 + $0x188] sm:$0xff] }
  0xff   : > { %410 = vrot.lane.b32.xlu1 %v3704_v62, %s3407_s20  ;;  %3216 = vmatmul.mubr.msk.f32.gmra.mxu0 %vm1094_vm3, %v1070_v34  ;;  %v4050_v34 = vld [vmem:[%s3453_s19 + $0xc0] sm:$0xff] }
 0x100   : > { %2025 = vrot.lane.b32.xlu0 %v3761_v61, %s3408_s25 }
 0x101   : > { %v988_v11 = vpop.permute.xlu1 %987  ;;  %v862_v32 = vpop.permute.xlu0 %861 }
 0x102   : > { %v1087_v25 = vsel %vm639_vm1, %v1055_v6, %v988_v11  ;;  %v1056_v62 = vsel %vm606_vm2, %v2824_v45, %v862_v32  ;;  %v254_v11 = vld [vmem:[%s3453_s19] sm:$0xff]  ;;  %v4062_v45 = vld [vmem:[%s3453_s19 + $0xc8] sm:$0xff] }
 0x103   : > { %412 = vrot.lane.b32.xlu1 %v3717_v2, %s3407_s20  ;;  %3242 = vmatprep.mubr.msk.f32.mxu1 %vm1094_vm3, %v1087_v25 }
 0x104   : > { %2027 = vrot.lane.b32.xlu0 %v3787_v35, %s3408_s25 }
 0x105   : > { %v990_v10 = vpop.permute.xlu1 %989  ;;  %v828_v58 = vpop.permute.xlu0 %827 }
 0x106   : > { %v1088_v44 = vsel %vm639_vm1, %v1056_v62, %v990_v10  ;;  %v1039_v2 = vsel %vm606_vm2, %v4012_v26, %v828_v58 }
 0x107   : > { %540 = vrot.lane.b32.xlu1 %v3728_v17, %s3408_s25  ;;  %3243 = vmatmul.mubr.msk.f32.gmra.mxu1 %vm1094_vm3, %v1088_v44  ;;  %v255_v44 = vld [vmem:[%s3453_s19 + $0x8] sm:$0xff] }
 0x108   : > { %538 = vrot.lane.b32.xlu0 %v3714_v1, %s3408_s25 }
 0x109   : > { %v956_v30 = vpop.permute.xlu1 %955  ;;  %v830_v40 = vpop.permute.xlu0 %829 }
 0x10a   : > { %v1071_v37 = vsel %vm639_vm1, %v1039_v2, %v956_v30  ;;  %v1040_v1 = vsel %vm606_vm2, %v4023_v41, %v830_v40  ;;  %v336_v40 = vld [vmem:[%s3453_s19 + $0xda] sm:$0xff] }
 0x10b   : > { %1903 = vrot.lane.b32.xlu1 %v3517_v15, %s3407_s20  ;;  %3218 = vmatprep.mubr.msk.f32.mxu0 %vm1094_vm3, %v1071_v37 }
 0x10c   : > { %1901 = vrot.lane.b32.xlu0 %v3504_v12, %s3407_s20 }
 0x10d   : > { %v958_v17 = vpop.permute.xlu1 %957  ;;  %v864_v7 = vpop.permute.xlu0 %863 }
 0x10e   : > { %v1072_v20 = vsel %vm639_vm1, %v1040_v1, %v958_v17  ;;  %v1057_v13 = vsel %vm606_vm2, %v2825_v50, %v864_v7 }
 0x10f   : > { %414 = vrot.lane.b32.xlu1 %v3752_v54, %s3407_s20  ;;  %3219 = vmatmul.mubr.msk.f32.gmra.mxu0 %vm1094_vm3, %v1072_v20 }
 0x110   : > { %2029 = vrot.lane.b32.xlu0 %v3514_v14, %s3408_s25 }
 0x111   : > { %v992_v5 = vpop.permute.xlu1 %991  ;;  %v866_v38 = vpop.permute.xlu0 %865 }
 0x112   : > { %v1089_v49 = vsel %vm639_vm1, %v1057_v13, %v992_v5  ;;  %v1058_v54 = vsel %vm606_vm2, %v2826_v53, %v866_v38  ;;  %v3042_v38 = vld [vmem:[%s3453_s19 + $0x112] sm:$0xff] }
 0x113   : > { %416 = vrot.lane.b32.xlu1 %v3765_v39, %s3407_s20  ;;  %3245 = vmatprep.mubr.msk.f32.mxu1 %vm1094_vm3, %v1089_v49 }
 0x114   : > { %2031 = vrot.lane.b32.xlu0 %v3532_v18, %s3408_s25 }
 0x115   : > { %v994_v14 = vpop.permute.xlu1 %993 }
 0x116   : > { %v1090_v31 = vsel %vm639_vm1, %v1058_v54, %v994_v14  ;;  %v832_v4 = vpop.permute.xlu0 %831  ;;  %v338_v54 = vld [vmem:[%s3453_s19 + $0xf2] sm:$0xff] }
 0x117   : > { %544 = vrot.lane.b32.xlu1 %v3787_v35, %s3408_s25  ;;  %3246 = vmatmul.mubr.msk.f32.gmra.mxu1 %vm1094_vm3, %v1090_v31  ;;  %v1041_v39 = vsel %vm606_vm2, %v4050_v34, %v832_v4 }
 0x118   : > { %542 = vrot.lane.b32.xlu0 %v3761_v61, %s3408_s25  ;;  %v607_v61 = vsel %vm606_vm2, %v254_v11, %v3677_v52  ;;  %v612_v11 = vsel %vm606_vm2, %v3836_v19, %v3696_v59 }
 0x119   : > { %v960_v6 = vpop.permute.xlu1 %959 }
 0x11a   : > { %v1073_v32 = vsel %vm639_vm1, %v1041_v39, %v960_v6  ;;  %v834_v25 = vpop.permute.xlu0 %833  ;;  %v3011_v6 = vld [vmem:[%s3453_s19 + $0x121] sm:$0xff] }
 0x11b   : > { %1907 = vrot.lane.b32.xlu1 %v3559_v23, %s3407_s20  ;;  %3221 = vmatprep.mubr.msk.f32.mxu0 %vm1094_vm3, %v1073_v32  ;;  %v1042_v62 = vsel %vm606_vm2, %v4062_v45, %v834_v25  ;;  %v608_v23 = vsel %vm606_vm2, %v255_v44, %v3689_v56  ;;  %v613_v44 = vsel %vm606_vm2, %v3863_v57, %v3708_v0 }
 0x11c   : > { %1905 = vrot.lane.b32.xlu0 %v3549_v21, %s3407_s20 }
 0x11d   : > { %v511_v35 = vpop.permute.xlu1 %510 }
 0x11e   : > { %v640_v10 = vsel %vm639_vm1, %v607_v61, %v511_v35  ;;  %v962_v58 = vpop.permute.xlu0 %961  ;;  %v308_v61 = vld [vmem:[%s3453_s19 + $0x109] sm:$0xff] }
 0x11f   : > { %v1074_v2 = vsel %vm639_vm1, %v1042_v62, %v962_v58  ;;  %418 = vrot.lane.b32.xlu1 %v3504_v12, %s3407_s20  ;;  %3252 = vmatprep.mubr.msk.f32.mxu1 %vm1094_vm3, %v640_v10  ;;  %v3043_v10 = vld [vmem:[%s3453_s19 + $0x122] sm:$0xff] }
 0x120   : > { %2033 = vrot.lane.b32.xlu0 %v3556_v22, %s3408_s25  ;;  %3222 = vmatmul.mubr.msk.f32.gmra.mxu0 %vm1094_vm3, %v1074_v2 }
 0x121   : > { %v1874_v21 = vpop.permute.xlu1 %1873 }
 0x122   : > { %v513_v52 = vpop.permute.xlu0 %512  ;;  %v2097_v12 = vsel %vm606_vm2, %v3825_v46, %v1874_v21  ;;  %v3044_v21 = vld [vmem:[%s3453_s19 + $0x12a] sm:$0xff] }
 0x123   : > { %v641_v30 = vsel %vm639_vm1, %v608_v23, %v513_v52  ;;  %420 = vrot.lane.b32.xlu1 %v3517_v15, %s3407_s20  ;;  %v609_v15 = vsel %vm606_vm2, %v3778_v47, %v3675_v51  ;;  %v610_v47 = vsel %vm606_vm2, %v3794_v42, %v3687_v55  ;;  %v611_v42 = vsel %vm606_vm2, %v3825_v46, %v3698_v60  ;;  %v4142_v60 = vld [vmem:[%s3453_s19 + $0x129] sm:$0xff] }
 0x124   : > { %2035 = vrot.lane.b32.xlu0 %v3566_v24, %s3408_s25  ;;  %3253 = vmatmul.mubr.msk.f32.vlgmr.msra.gmra.mxu1 %vm1094_vm3, %v641_v30 }
 0x125   : > { %v2002_v22 = vpop.permute.xlu1 %2001 }
 0x126   : > { %v2129_v37 = vsel %vm639_vm1, %v2097_v12, %v2002_v22  ;;  %v1876_v56 = vpop.permute.xlu0 %1875  ;;  %v614_v22 = vsel %vm606_vm2, %v3874_v9, %v3706_v63  ;;  %v615_v63 = vsel %vm606_vm2, %v3901_v36, %v3721_v16 }
 0x127   : > { %548 = vrot.lane.b32.xlu1 %v3532_v18, %s3408_s25  ;;  %3304 = vmatprep.mubr.msk.f32.mxu0 %vm1094_vm3, %v2129_v37  ;;  %v2098_v1 = vsel %vm606_vm2, %v3836_v19, %v1876_v56  ;;  %v306_v18 = vld [vmem:[%s3453_s19 + $0xf1] sm:$0xff]  ;;  %v3014_v56 = vld [vmem:[%s3453_s19 + $0x141] sm:$0xff] }
 0x128   : > { %546 = vrot.lane.b32.xlu0 %v336_v40, %s3408_s25  ;;  %v309_v19 = vld [vmem:[%s3453_s19 + $0x111] sm:$0xff] }
 0x129   : > { %v515_v24 = vpop.permute.xlu1 %514 }
 0x12a   : > { %v642_v17 = vsel %vm639_vm1, %v609_v15, %v515_v24  ;;  %v2004_v7 = vpop.permute.xlu0 %2003 }
 0x12b   : > { %v2130_v20 = vsel %vm639_vm1, %v2098_v1, %v2004_v7  ;;  %1911 = vrot.lane.b32.xlu1 %v3593_v29, %s3407_s20  ;;  %3255 = vmatprep.mubr.msk.f32.mxu1 %vm1094_vm3, %v642_v17  ;;  %v3013_v1 = vld [vmem:[%s3453_s19 + $0x139] sm:$0xff] }
 0x12c   : > { %1909 = vrot.lane.b32.xlu0 %v3583_v27, %s3407_s20  ;;  %3305 = vmatmul.mubr.msk.f32.vlgmr.msra.gmra.mxu0 %vm1094_vm3, %v2130_v20  ;;  %v307_v27 = vld [vmem:[%s3453_s19 + $0xf9] sm:$0xff] }
 0x12d   : > { %v1878_v51 = vpop.permute.xlu1 %1877  ;;  %v3045_v20 = vld [vmem:[%s3453_s19 + $0x13a] sm:$0xff] }
 0x12e   : > { %v517_v50 = vpop.permute.xlu0 %516  ;;  %v2099_v29 = vsel %vm606_vm2, %v3863_v57, %v1878_v51  ;;  %v340_v57 = vld [vmem:[%s3453_s19 + $0x10a] sm:$0xff] }
 0x12f   : > { %v643_v13 = vsel %vm639_vm1, %v610_v47, %v517_v50  ;;  %422 = vrot.lane.b32.xlu1 %v306_v18, %s3407_s20 }
 0x130   : > { %2037 = vrot.lane.b32.xlu0 %v3590_v28, %s3408_s25  ;;  %3256 = vmatmul.mubr.msk.f32.gmra.mxu1 %vm1094_vm3, %v643_v13  ;;  %v339_v28 = vld [vmem:[%s3453_s19 + $0xfa] sm:$0xff] }
 0x131   : > { %v2006_v5 = vpop.permute.xlu1 %2005  ;;  %v4622_v13 = vld [vmem:[#allocation2_spill] sm:$0xff] }
 0x132   : > { %v2131_v49 = vsel %vm639_vm1, %v2099_v29, %v2006_v5  ;;  %v1880_v55 = vpop.permute.xlu0 %1879 }
 0x133   : > { %424 = vrot.lane.b32.xlu1 %v307_v27, %s3407_s20  ;;  %3307 = vmatprep.mubr.msk.f32.mxu0 %vm1094_vm3, %v2131_v49  ;;  %v2100_v14 = vsel %vm606_vm2, %v3874_v9, %v1880_v55  ;;  %v616_v27 = vsel %vm606_vm2, %v3912_v48, %v4622_v13 }
 0x134   : > { %2039 = vrot.lane.b32.xlu0 %v3042_v38, %s3408_s25 }
 0x135   : > { %v519_v53 = vpop.permute.xlu1 %518 }
 0x136   : > { %v644_v31 = vsel %vm639_vm1, %v611_v42, %v519_v53  ;;  %v2008_v4 = vpop.permute.xlu0 %2007  ;;  %v4623_v42 = vld [vmem:[#allocation4_spill] sm:$0xff] }
 0x137   : > { %v2132_v39 = vsel %vm639_vm1, %v2100_v14, %v2008_v4  ;;  %552 = vrot.lane.b32.xlu1 %v339_v28, %s3408_s25  ;;  %3258 = vmatprep.mubr.msk.f32.mxu1 %vm1094_vm3, %v644_v31  ;;  %v617_v53 = vsel %vm606_vm2, %v3939_v33, %v4623_v42  ;;  %v3015_v14 = vld [vmem:[%s3453_s19 + $0x151] sm:$0xff] }
 0x138   : > { %550 = vrot.lane.b32.xlu0 %v338_v54, %s3408_s25  ;;  %3308 = vmatmul.mubr.msk.f32.gmra.mxu0 %vm1094_vm3, %v2132_v39 }
 0x139   : > { %v1882_v46 = vpop.permute.xlu1 %1881 }
 0x13a   : > { %v521_v32 = vpop.permute.xlu0 %520  ;;  %v2101_v35 = vsel %vm606_vm2, %v3901_v36, %v1882_v46  ;;  %v3046_v36 = vld [vmem:[%s3453_s19 + $0x142] sm:$0xff]  ;;  %v3047_v46 = vld [vmem:[%s3453_s19 + $0x152] sm:$0xff] }
 0x13b   : > { %v645_v25 = vsel %vm639_vm1, %v612_v11, %v521_v32  ;;  %1915 = vrot.lane.b32.xlu1 %v4142_v60, %s3407_s20 }
 0x13c   : > { %1913 = vrot.lane.b32.xlu0 %v3011_v6, %s3407_s20  ;;  %3259 = vmatmul.mubr.msk.f32.gmra.mxu1 %vm1094_vm3, %v645_v25 }
 0x13d   : > { %v2010_v62 = vpop.permute.xlu1 %2009 }
 0x13e   : > { %v2133_v58 = vsel %vm639_vm1, %v2101_v35, %v2010_v62  ;;  %v1884_v59 = vpop.permute.xlu0 %1883  ;;  %v3048_v62 = vld [vmem:[%s3453_s19 + $0x15a] sm:$0xff] }
 0x13f   : > { %426 = vrot.lane.b32.xlu1 %v308_v61, %s3407_s20  ;;  %3310 = vmatprep.mubr.msk.f32.mxu0 %vm1094_vm3, %v2133_v58  ;;  %v2102_v23 = vsel %vm606_vm2, %v3912_v48, %v1884_v59  ;;  %v3016_v48 = vld [vmem:[%s3453_s19 + $0x159] sm:$0xff] }
 0x140   : > { %2041 = vrot.lane.b32.xlu0 %v3043_v10, %s3408_s25 }
 0x141   : > { %v523_v2 = vpop.permute.xlu1 %522 }
 0x142   : > { %v646_v52 = vsel %vm639_vm1, %v613_v44, %v523_v2  ;;  %v2012_v30 = vpop.permute.xlu0 %2011  ;;  %v3018_v2 = vld [vmem:[%s3453_s19 + $0x171] sm:$0xff] }
 0x143   : > { %v2134_v12 = vsel %vm639_vm1, %v2102_v23, %v2012_v30  ;;  %428 = vrot.lane.b32.xlu1 %v309_v19, %s3407_s20  ;;  %3261 = vmatprep.mubr.msk.f32.mxu1 %vm1094_vm3, %v646_v52  ;;  %v3017_v52 = vld [vmem:[%s3453_s19 + $0x169] sm:$0xff]  ;;  %v4625_v30 = vld [vmem:[#allocation5_spill] sm:$0xff] }
 0x144   : > { %2043 = vrot.lane.b32.xlu0 %v3044_v21, %s3408_s25  ;;  %3311 = vmatmul.mubr.msk.f32.gmra.mxu0 %vm1094_vm3, %v2134_v12  ;;  %v619_v12 = vsel %vm606_vm2, %v3977_v8, %v4625_v30 }
 0x145   : > { %v1886_v0 = vpop.permute.xlu1 %1885 }
 0x146   : > { %v525_v40 = vpop.permute.xlu0 %524  ;;  %v2103_v15 = vsel %vm606_vm2, %v3939_v33, %v1886_v0 }
 0x147   : > { %v647_v37 = vsel %vm639_vm1, %v614_v22, %v525_v40  ;;  %556 = vrot.lane.b32.xlu1 %v3042_v38, %s3408_s25  ;;  %v3049_v40 = vld [vmem:[%s3453_s19 + $0x16a] sm:$0xff] }
 0x148   : > { %554 = vrot.lane.b32.xlu0 %v340_v57, %s3408_s25  ;;  %3262 = vmatmul.mubr.msk.f32.gmra.mxu1 %vm1094_vm3, %v647_v37 }
 0x149   : > { %v2014_v24 = vpop.permute.xlu1 %2013 }
 0x14a   : > { %v2135_v17 = vsel %vm639_vm1, %v2103_v15, %v2014_v24  ;;  %v1888_v7 = vpop.permute.xlu0 %1887 }
 0x14b   : > { %1919 = vrot.lane.b32.xlu1 %v3014_v56, %s3407_s20  ;;  %3313 = vmatprep.mubr.msk.f32.mxu0 %vm1094_vm3, %v2135_v17  ;;  %v2104_v18 = vsel %vm606_vm2, %v3950_v43, %v1888_v7 }
 0x14c   : > { %1917 = vrot.lane.b32.xlu0 %v3013_v1, %s3407_s20 }
 0x14d   : > { %v527_v9 = vpop.permute.xlu1 %526 }
 0x14e   : > { %v648_v51 = vsel %vm639_vm1, %v615_v63, %v527_v9  ;;  %v2016_v47 = vpop.permute.xlu0 %2015 }
 0x14f   : > { %v2136_v50 = vsel %vm639_vm1, %v2104_v18, %v2016_v47  ;;  %430 = vrot.lane.b32.xlu1 %v3011_v6, %s3407_s20  ;;  %3264 = vmatprep.mubr.msk.f32.mxu1 %vm1094_vm3, %v648_v51  ;;  %v4624_v6 = vld [vmem:[#allocation3_spill] sm:$0xff] }
 0x150   : > { %2045 = vrot.lane.b32.xlu0 %v3045_v20, %s3408_s25  ;;  %3314 = vmatmul.mubr.msk.f32.gmra.mxu0 %vm1094_vm3, %v2136_v50  ;;  %v618_v11 = vsel %vm606_vm2, %v3950_v43, %v4624_v6  ;;  %v3019_v47 = vld [vmem:[%s3453_s19 + $0x181] sm:$0xff] }
 0x151   : > { %v1890_v16 = vpop.permute.xlu1 %1889 }
 0x152   : > { %v529_v29 = vpop.permute.xlu0 %528  ;;  %v2105_v38 = vsel %vm606_vm2, %v3977_v8, %v1890_v16 }
 0x153   : > { %v649_v5 = vsel %vm639_vm1, %v616_v27, %v529_v29  ;;  %432 = vrot.lane.b32.xlu1 %v4142_v60, %s3407_s20  ;;  %v3051_v27 = vld [vmem:[%s3453_s19 + $0x182] sm:$0xff] }
 0x154   : > { %2047 = vrot.lane.b32.xlu0 %v3046_v36, %s3408_s25  ;;  %3265 = vmatmul.mubr.msk.f32.gmra.mxu1 %vm1094_vm3, %v649_v5  ;;  %v2973_v5 = vld [vmem:[%s3453_s19 + $0xd8] sm:$0xff] }
 0x155   : > { %v2018_v49 = vpop.permute.xlu1 %2017 }
 0x156   : > { %v2137_v55 = vsel %vm639_vm1, %v2105_v38, %v2018_v49  ;;  %v1892_v28 = vpop.permute.xlu0 %1891  ;;  %v3052_v38 = vld [vmem:[%s3453_s19 + $0x18a] sm:$0xff] }
 0x157   : > { %560 = vrot.lane.b32.xlu1 %v3044_v21, %s3408_s25  ;;  %3316 = vmatprep.mubr.msk.f32.mxu0 %vm1094_vm3, %v2137_v55  ;;  %v2106_v31 = vsel %vm606_vm2, %v3985_v3, %v1892_v28  ;;  %v2974_v28 = vld [vmem:[%s3453_s19 + $0xe0] sm:$0xff] }
 0x158   : > { %558 = vrot.lane.b32.xlu0 %v3043_v10, %s3408_s25 }
 0x159   : > { %v531_v54 = vpop.permute.xlu1 %530 }
 0x15a   : > { %v650_v4 = vsel %vm639_vm1, %v617_v53, %v531_v54  ;;  %v2020_v39 = vpop.permute.xlu0 %2019 }
 0x15b   : > { %v2138_v60 = vsel %vm639_vm1, %v2106_v31, %v2020_v39  ;;  %1923 = vrot.lane.b32.xlu1 %v3016_v48, %s3407_s20  ;;  %3267 = vmatprep.mubr.msk.f32.mxu1 %vm1094_vm3, %v650_v4  ;;  %v3022_v31 = vld [vmem:[%s3453_s19 + $0x1a1] sm:$0xff] }
 0x15c   : > { %1921 = vrot.lane.b32.xlu0 %v3015_v14, %s3407_s20  ;;  %3317 = vmatmul.mubr.msk.f32.gmra.mxu0 %vm1094_vm3, %v2138_v60  ;;  %v3021_v60 = vld [vmem:[%s3453_s19 + $0x199] sm:$0xff] }
 0x15d   : > { %v1894_v33 = vpop.permute.xlu1 %1893 }
 0x15e   : > { %v533_v32 = vpop.permute.xlu0 %532  ;;  %v2107_v61 = vsel %vm606_vm2, %v4012_v26, %v1894_v33 }
 0x15f   : > { %v651_v25 = vsel %vm639_vm1, %v618_v11, %v533_v32  ;;  %434 = vrot.lane.b32.xlu1 %v3013_v1, %s3407_s20  ;;  %v3054_v32 = vld [vmem:[%s3453_s19 + $0x1a2] sm:$0xff] }
 0x160   : > { %2049 = vrot.lane.b32.xlu0 %v3047_v46, %s3408_s25  ;;  %3268 = vmatmul.mubr.msk.f32.gmra.mxu1 %vm1094_vm3, %v651_v25  ;;  %v3053_v25 = vld [vmem:[%s3453_s19 + $0x19a] sm:$0xff] }
 0x161   : > { %v2022_v35 = vpop.permute.xlu1 %2021 }
 0x162   : > { %v2139_v10 = vsel %vm639_vm1, %v2107_v61, %v2022_v35  ;;  %v1896_v58 = vpop.permute.xlu0 %1895  ;;  %v2975_v35 = vld [vmem:[%s3453_s19 + $0xf0] sm:$0xff] }
 0x163   : > { %436 = vrot.lane.b32.xlu1 %v3014_v56, %s3407_s20  ;;  %3319 = vmatprep.mubr.msk.f32.mxu0 %vm1094_vm3, %v2139_v10  ;;  %v2108_v59 = vsel %vm606_vm2, %v4023_v41, %v1896_v58  ;;  %v3050_v56 = vld [vmem:[%s3453_s19 + $0x172] sm:$0xff] }
 0x164   : > { %2051 = vrot.lane.b32.xlu0 %v3048_v62, %s3408_s25  ;;  %v2976_v58 = vld [vmem:[%s3453_s19 + $0xf8] sm:$0xff] }
 0x165   : > { %v409_v43 = vpop.permute.xlu1 %408 }
 0x166   : > { %v2024_v19 = vpop.permute.xlu0 %2023  ;;  %v620_v21 = vsel %vm606_vm2, %v3985_v3, %v409_v43 }
 0x167   : > { %v2140_v44 = vsel %vm639_vm1, %v2108_v59, %v2024_v19  ;;  %564 = vrot.lane.b32.xlu1 %v3046_v36, %s3408_s25 }
 0x168   : > { %562 = vrot.lane.b32.xlu0 %v3045_v20, %s3408_s25  ;;  %3320 = vmatmul.mubr.msk.f32.gmra.mxu0 %vm1094_vm3, %v2140_v44  ;;  %v3020_v20 = vld [vmem:[%s3453_s19 + $0x189] sm:$0xff] }
 0x169   : > { %v537_v23 = vpop.permute.xlu1 %536 }
 0x16a   : > { %v653_v0 = vsel %vm639_vm1, %v620_v21, %v537_v23  ;;  %v535_v57 = vpop.permute.xlu0 %534 }
 0x16b   : > { %v652_v22 = vsel %vm639_vm1, %v619_v12, %v535_v57  ;;  %1927 = vrot.lane.b32.xlu1 %v3018_v2, %s3407_s20 }
 0x16c   : > { %1925 = vrot.lane.b32.xlu0 %v3017_v52, %s3407_s20  ;;  %3270 = vmatprep.mubr.msk.f32.mxu1 %vm1094_vm3, %v652_v22 }
 0x16d   : > { %3271 = vmatmul.mubr.msk.f32.gmra.mxu1 %vm1094_vm3, %v653_v0  ;;  %v1900_v3 = vpop.permute.xlu1 %1899 }
 0x16e   : > { %v1898_v37 = vpop.permute.xlu0 %1897  ;;  %v2110_v7 = vsel %vm606_vm2, %v4062_v45, %v1900_v3  ;;  %v2977_v3 = vld [vmem:[%s3453_s19 + $0x108] sm:$0xff] }
 0x16f   : > { %438 = vrot.lane.b32.xlu1 %v3015_v14, %s3407_s20  ;;  %v2109_v15 = vsel %vm606_vm2, %v4050_v34, %v1898_v37 }
 0x170   : > { %2053 = vrot.lane.b32.xlu0 %v3049_v40, %s3408_s25 }
 0x171   : > { %v411_v8 = vpop.permute.xlu1 %410 }
 0x172   : > { %v2026_v24 = vpop.permute.xlu0 %2025  ;;  %v621_v50 = vsel %vm606_vm2, %v4012_v26, %v411_v8 }
 0x173   : > { %v2141_v1 = vsel %vm639_vm1, %v2109_v15, %v2026_v24  ;;  %440 = vrot.lane.b32.xlu1 %v3016_v48, %s3407_s20 }
 0x174   : > { %2055 = vrot.lane.b32.xlu0 %v3050_v56, %s3408_s25  ;;  %3322 = vmatprep.mubr.msk.f32.mxu0 %vm1094_vm3, %v2141_v1 }
 0x175   : > { %v413_v17 = vpop.permute.xlu1 %412 }
 0x176   : > { %v2028_v63 = vpop.permute.xlu0 %2027  ;;  %v622_v18 = vsel %vm606_vm2, %v4023_v41, %v413_v17 }
 0x177   : > { %v2142_v9 = vsel %vm639_vm1, %v2110_v7, %v2028_v63  ;;  %568 = vrot.lane.b32.xlu1 %v3048_v62, %s3408_s25 }
 0x178   : > { %566 = vrot.lane.b32.xlu0 %v3047_v46, %s3408_s25  ;;  %3323 = vmatmul.mubr.msk.f32.gmra.mxu0 %vm1094_vm3, %v2142_v9 }
 0x179   : > { %v541_v51 = vpop.permute.xlu1 %540 }
 0x17a   : > { %v655_v16 = vsel %vm639_vm1, %v622_v18, %v541_v51  ;;  %v539_v36 = vpop.permute.xlu0 %538 }
 0x17b   : > { %v654_v13 = vsel %vm639_vm1, %v621_v50, %v539_v36  ;;  %1931 = vrot.lane.b32.xlu1 %v3020_v20, %s3407_s20  ;;  %v2979_v36 = vld [vmem:[%s3453_s19 + $0x120] sm:$0xff] }
 0x17c   : > { %1929 = vrot.lane.b32.xlu0 %v3019_v47, %s3407_s20  ;;  %3273 = vmatprep.mubr.msk.f32.mxu1 %vm1094_vm3, %v654_v13 }
 0x17d   : > { %3274 = vmatmul.mubr.msk.f32.gmra.mxu1 %vm1094_vm3, %v655_v16  ;;  %v1904_v41 = vpop.permute.xlu1 %1903 }
 0x17e   : > { %v1902_v29 = vpop.permute.xlu0 %1901  ;;  %v2112_v53 = vsel %vm606_vm2, %v2974_v28, %v1904_v41 }
 0x17f   : > { %442 = vrot.lane.b32.xlu1 %v3017_v52, %s3407_s20  ;;  %v2111_v49 = vsel %vm606_vm2, %v2973_v5, %v1902_v29  ;;  %v2980_v29 = vld [vmem:[%s3453_s19 + $0x128] sm:$0xff] }
 0x180   : > { %2057 = vrot.lane.b32.xlu0 %v3051_v27, %s3408_s25 }
 0x181   : > { %v415_v26 = vpop.permute.xlu1 %414 }
 0x182   : > { %v2030_v55 = vpop.permute.xlu0 %2029  ;;  %v623_v33 = vsel %vm606_vm2, %v4050_v34, %v415_v26 }
 0x183   : > { %v2143_v48 = vsel %vm639_vm1, %v2111_v49, %v2030_v55  ;;  %444 = vrot.lane.b32.xlu1 %v3018_v2, %s3407_s20 }
 0x184   : > { %2059 = vrot.lane.b32.xlu0 %v3052_v38, %s3408_s25  ;;  %3325 = vmatprep.mubr.msk.f32.mxu0 %vm1094_vm3, %v2143_v48  ;;  %v4357_v38 = vpop.f32.mrf.mxu1 }
 0x185   : > { %v417_v42 = vpop.permute.xlu1 %416 }
 0x186   : > { %v2032_v54 = vpop.permute.xlu0 %2031  ;;  %v624_v4 = vsel %vm606_vm2, %v4062_v45, %v417_v42 }
 0x187   : > { %v2144_v14 = vsel %vm639_vm1, %v2112_v53, %v2032_v54  ;;  %572 = vrot.lane.b32.xlu1 %v3050_v56, %s3408_s25  ;;  %v2978_v56 = vld [vmem:[%s3453_s19 + $0x110] sm:$0xff]  ;;  %v4363_v53 = vpop.f32.mrf.mxu1 }
 0x188   : > { %570 = vrot.lane.b32.xlu0 %v3049_v40, %s3408_s25  ;;  %3326 = vmatmul.mubr.msk.f32.gmra.mxu0 %vm1094_vm3, %v2144_v14 }
 0x189   : > { %v545_v39 = vpop.permute.xlu1 %544 }
 0x18a   : > { %v657_v46 = vsel %vm639_vm1, %v624_v4, %v545_v39  ;;  %v543_v6 = vpop.permute.xlu0 %542  ;;  %v4367_v4 = vpop.f32.mrf.mxu0 }
 0x18b   : > { %v656_v11 = vsel %vm639_vm1, %v623_v33, %v543_v6  ;;  %1935 = vrot.lane.b32.xlu1 %v3022_v31, %s3407_s20 }
 0x18c   : > { %1933 = vrot.lane.b32.xlu0 %v3021_v60, %s3407_s20  ;;  %3276 = vmatprep.mubr.msk.f32.mxu1 %vm1094_vm3, %v656_v11  ;;  %v4370_v60 = vpop.f32.mrf.mxu1  ;;  %v4374_v6 = vpop.f32.mrf.mxu0  ;;  %v2981_v11 = vld [vmem:[%s3453_s19 + $0x138] sm:$0xff] }
 0x18d   : > { %3277 = vmatmul.mubr.msk.f32.gmra.mxu1 %vm1094_vm3, %v657_v46  ;;  %v1908_v45 = vpop.permute.xlu1 %1907 }
 0x18e   : > { %v1906_v61 = vpop.permute.xlu0 %1905  ;;  %v2114_v19 = vsel %vm606_vm2, %v2976_v58, %v1908_v45  ;;  %v4379_v45 = vpop.f32.mrf.mxu0 }
 0x18f   : > { %2063 = vrot.lane.b32.xlu1 %v3054_v32, %s3408_s25  ;;  %v2113_v62 = vsel %vm606_vm2, %v2975_v35, %v1906_v61  ;;  %v4377_v32 = vpop.f32.mrf.mxu1 }
 0x190   : > { %2061 = vrot.lane.b32.xlu0 %v3053_v25, %s3408_s25 }
 0x191   : > { %v419_v34 = vpop.permute.xlu1 %418  ;;  %v4381_v61 = vpop.f32.mrf.mxu1 }
 0x192   : > { %v2034_v10 = vpop.permute.xlu0 %2033  ;;  %v625_v52 = vsel %vm606_vm2, %v2973_v5, %v419_v34 }
 0x193   : > { %v2145_v43 = vsel %vm639_vm1, %v2113_v62, %v2034_v10  ;;  %v2982_v62 = vld [vmem:[%s3453_s19 + $0x140] sm:$0xff] }
 0x194   : > { %3328 = vmatprep.mubr.msk.f32.mxu0 %vm1094_vm3, %v2145_v43 }
 0x195   : > { %v421_v59 = vpop.permute.xlu1 %420 }
 0x196   : > { %v2036_v44 = vpop.permute.xlu0 %2035  ;;  %v626_v21 = vsel %vm606_vm2, %v2974_v28, %v421_v59  ;;  %v4389_v59 = vpop.f32.mrf.mxu1 }
 0x197   : > { %v2146_v2 = vsel %vm639_vm1, %v2114_v19, %v2036_v44 }
 0x198   : > { %3329 = vmatmul.mubr.msk.f32.gmra.mxu0 %vm1094_vm3, %v2146_v2 }
 0x199   : > { %v549_v23 = vpop.permute.xlu1 %548 }
 0x19a   : > { %v659_v30 = vsel %vm639_vm1, %v626_v21, %v549_v23  ;;  %v547_v12 = vpop.permute.xlu0 %546  ;;  %v4395_v23 = vpop.f32.mrf.mxu1 }
 0x19b   : > { %v658_v0 = vsel %vm639_vm1, %v625_v52, %v547_v12 }
 0x19c   : > { %3279 = vmatprep.mubr.msk.f32.mxu1 %vm1094_vm3, %v658_v0 }
 0x19d   : > { %3280 = vmatmul.mubr.msk.f32.gmra.mxu1 %vm1094_vm3, %v659_v30  ;;  %v1912_v57 = vpop.permute.xlu1 %1911 }
 0x19e   : > { %v1910_v22 = vpop.permute.xlu0 %1909  ;;  %v2116_v1 = vsel %vm606_vm2, %v2978_v56, %v1912_v57 }
 0x19f   : > { %v2115_v37 = vsel %vm606_vm2, %v2977_v3, %v1910_v22 }
 0x1a1   : > { %v423_v40 = vpop.permute.xlu1 %422 }
 0x1a2   : > { %v2038_v8 = vpop.permute.xlu0 %2037  ;;  %v627_v20 = vsel %vm606_vm2, %v2975_v35, %v423_v40  ;;  %v4404_v40 = vpop.f32.mrf.mxu1 }
 0x1a3   : > { %v2147_v15 = vsel %vm639_vm1, %v2115_v37, %v2038_v8 }
 0x1a4   : > { %3331 = vmatprep.mubr.msk.f32.mxu0 %vm1094_vm3, %v2147_v15 }
 0x1a5   : > { %v425_v24 = vpop.permute.xlu1 %424 }
 0x1a6   : > { %v2040_v17 = vpop.permute.xlu0 %2039  ;;  %v628_v63 = vsel %vm606_vm2, %v2976_v58, %v425_v24  ;;  %v4387_v58 = vpop.f32.mrf.mxu0  ;;  %v2983_v24 = vld [vmem:[%s3453_s19 + $0x150] sm:$0xff] }
 0x1a7   : > { %v2148_v7 = vsel %vm639_vm1, %v2116_v1, %v2040_v17 }
 0x1a8   : > { %3332 = vmatmul.mubr.msk.f32.gmra.mxu0 %vm1094_vm3, %v2148_v7  ;;  %v4392_v2 = vpop.f32.mrf.mxu0 }
 0x1a9   : > { %v553_v9 = vpop.permute.xlu1 %552 }
 0x1aa   : > { %v661_v18 = vsel %vm639_vm1, %v628_v63, %v553_v9  ;;  %v551_v51 = vpop.permute.xlu0 %550  ;;  %v4401_v22 = vpop.f32.mrf.mxu0 }
 0x1ab   : > { %v660_v47 = vsel %vm639_vm1, %v627_v20, %v551_v51 }
 0x1ac   : > { %3282 = vmatprep.mubr.msk.f32.mxu1 %vm1094_vm3, %v660_v47  ;;  %v4407_v37 = vpop.f32.mrf.mxu0 }
 0x1ad   : > { %3283 = vmatmul.mubr.msk.f32.gmra.mxu1 %vm1094_vm3, %v661_v18  ;;  %v1916_v50 = vpop.permute.xlu1 %1915  ;;  %v2984_v18 = vld [vmem:[%s3453_s19 + $0x158] sm:$0xff] }
 0x1ae   : > { %v1914_v16 = vpop.permute.xlu0 %1913  ;;  %v2118_v49 = vsel %vm606_vm2, %v2980_v29, %v1916_v50  ;;  %v4413_v1 = vpop.f32.mrf.mxu0 }
 0x1af   : > { %v2117_v41 = vsel %vm606_vm2, %v2979_v36, %v1914_v16 }
 0x1b0   : > { %v4418_v20 = vpop.f32.mrf.mxu0 }
 0x1b1   : > { %v427_v13 = vpop.permute.xlu1 %426 }
 0x1b2   : > { %v2042_v27 = vpop.permute.xlu0 %2041  ;;  %v629_v54 = vsel %vm606_vm2, %v2977_v3, %v427_v13  ;;  %v4426_v13 = vpop.f32.mrf.mxu0 }
 0x1b3   : > { %v2149_v5 = vsel %vm639_vm1, %v2117_v41, %v2042_v27 }
 0x1b4   : > { %3334 = vmatprep.mubr.msk.f32.mxu0 %vm1094_vm3, %v2149_v5 }
 0x1b5   : > { %v429_v26 = vpop.permute.xlu1 %428 }
 0x1b6   : > { %v2044_v55 = vpop.permute.xlu0 %2043  ;;  %v630_v48 = vsel %vm606_vm2, %v2978_v56, %v429_v26  ;;  %v4410_v56 = vpop.f32.mrf.mxu1 }
 0x1b7   : > { %v2150_v28 = vsel %vm639_vm1, %v2118_v49, %v2044_v55 }
 0x1b8   : > { %3335 = vmatmul.mubr.msk.f32.gmra.mxu0 %vm1094_vm3, %v2150_v28  ;;  %v4415_v7 = vpop.f32.mrf.mxu1 }
 0x1b9   : > { %v557_v42 = vpop.permute.xlu1 %556 }
 0x1ba   : > { %v663_v14 = vsel %vm639_vm1, %v630_v48, %v557_v42  ;;  %v555_v31 = vpop.permute.xlu0 %554  ;;  %v4422_v47 = vpop.f32.mrf.mxu1 }
 0x1bb   : > { %v662_v39 = vsel %vm639_vm1, %v629_v54, %v555_v31 }
 0x1bc   : > { %3285 = vmatprep.mubr.msk.f32.mxu1 %vm1094_vm3, %v662_v39  ;;  %v4429_v27 = vpop.f32.mrf.mxu1 }
 0x1bd   : > { %3286 = vmatmul.mubr.msk.f32.gmra.mxu1 %vm1094_vm3, %v663_v14  ;;  %v1920_v33 = vpop.permute.xlu1 %1919 }
 0x1be   : > { %v1918_v46 = vpop.permute.xlu0 %1917  ;;  %v2120_v19 = vsel %vm606_vm2, %v2982_v62, %v1920_v33 }
 0x1bf   : > { %v2119_v35 = vsel %vm606_vm2, %v2981_v11, %v1918_v46  ;;  %v4449_v46 = vld [vmem:[%s3453_s19 + $0x168] sm:$0xff] }
 0x1c1   : > { %v431_v25 = vpop.permute.xlu1 %430 }
 0x1c2   : > { %v2046_v34 = vpop.permute.xlu0 %2045  ;;  %v631_v12 = vsel %vm606_vm2, %v2979_v36, %v431_v25 }
 0x1c3   : > { %v2151_v10 = vsel %vm639_vm1, %v2119_v35, %v2046_v34 }
 0x1c4   : > { %3337 = vmatprep.mubr.msk.f32.mxu0 %vm1094_vm3, %v2151_v10  ;;  %v2986_v10 = vld [vmem:[%s3453_s19 + $0x170] sm:$0xff] }
 0x1c5   : > { %v433_v43 = vpop.permute.xlu1 %432 }
 0x1c6   : > { %v2048_v44 = vpop.permute.xlu0 %2047  ;;  %v632_v52 = vsel %vm606_vm2, %v2980_v29, %v433_v43  ;;  %v4432_v29 = vpop.f32.mrf.mxu0 }
 0x1c7   : > { %v2152_v21 = vsel %vm639_vm1, %v2120_v19, %v2048_v44  ;;  %v4435_v49 = vpop.f32.mrf.mxu1 }
 0x1c8   : > { %3338 = vmatmul.mubr.msk.f32.gmra.mxu0 %vm1094_vm3, %v2152_v21  ;;  %v4441_v54 = vpop.f32.mrf.mxu0 }
 0x1c9   : > { %v561_v30 = vpop.permute.xlu1 %560  ;;  %v4444_v31 = vpop.f32.mrf.mxu1 }
 0x1ca   : > { %v665_v0 = vsel %vm639_vm1, %v632_v52, %v561_v30  ;;  %v559_v57 = vpop.permute.xlu0 %558 }
 0x1cb   : > { %v664_v3 = vsel %vm639_vm1, %v631_v12, %v559_v57 }
 0x1cc   : > { %3288 = vmatprep.mubr.msk.f32.mxu1 %vm1094_vm3, %v664_v3 }
 0x1cd   : > { %3289 = vmatmul.mubr.msk.f32.gmra.mxu1 %vm1094_vm3, %v665_v0  ;;  %v1924_v8 = vpop.permute.xlu1 %1923 }
 0x1ce   : > { %v1922_v15 = vpop.permute.xlu0 %1921  ;;  %v2122_v16 = vsel %vm606_vm2, %v2984_v18, %v1924_v8 }
 0x1cf   : > { %v2121_v63 = vsel %vm606_vm2, %v2983_v24, %v1922_v15  ;;  %v4446_v33 = vpop.f32.mrf.mxu0 }
 0x1d1   : > { %v435_v17 = vpop.permute.xlu1 %434 }
 0x1d2   : > { %v2050_v9 = vpop.permute.xlu0 %2049  ;;  %v633_v55 = vsel %vm606_vm2, %v2981_v11, %v435_v17 }
 0x1d3   : > { %v2153_v51 = vsel %vm639_vm1, %v2121_v63, %v2050_v9 }
 0x1d4   : > { %3340 = vmatprep.mubr.msk.f32.mxu0 %vm1094_vm3, %v2153_v51 }
 0x1d5   : > { %v437_v50 = vpop.permute.xlu1 %436 }
 0x1d6   : > { %v2052_v36 = vpop.permute.xlu0 %2051  ;;  %v634_v5 = vsel %vm606_vm2, %v2982_v62, %v437_v50  ;;  %v4455_v62 = vpop.f32.mrf.mxu0 }
 0x1d7   : > { %v2154_v41 = vsel %vm639_vm1, %v2122_v16, %v2052_v36  ;;  %v4451_v11 = vpop.f32.mrf.mxu1 }
 0x1d8   : > { %3341 = vmatmul.mubr.msk.f32.gmra.mxu0 %vm1094_vm3, %v2154_v41 }
 0x1d9   : > { %v565_v26 = vpop.permute.xlu1 %564  ;;  %v4459_v19 = vpop.f32.mrf.mxu1 }
 0x1da   : > { %v667_v28 = vsel %vm639_vm1, %v634_v5, %v565_v26  ;;  %v563_v48 = vpop.permute.xlu0 %562 }
 0x1db   : > { %v666_v42 = vsel %vm639_vm1, %v633_v55, %v563_v48 }
 0x1dc   : > { %3291 = vmatprep.mubr.msk.f32.mxu1 %vm1094_vm3, %v666_v42 }
 0x1dd   : > { %3292 = vmatmul.mubr.msk.f32.gmra.mxu1 %vm1094_vm3, %v667_v28  ;;  %v1928_v14 = vpop.permute.xlu1 %1927  ;;  %v2987_v28 = vld [vmem:[%s3453_s19 + $0x180] sm:$0xff] }
 0x1de   : > { %v1926_v39 = vpop.permute.xlu0 %1925  ;;  %v2124_v52 = vsel %vm606_vm2, %v2986_v10, %v1928_v14 }
 0x1df   : > { %v2123_v35 = vsel %vm606_vm2, %v4449_v46, %v1926_v39 }
 0x1e0   : > { %v4462_v44 = vpop.f32.mrf.mxu0 }
 0x1e1   : > { %v439_v25 = vpop.permute.xlu1 %438 }
 0x1e2   : > { %v2054_v34 = vpop.permute.xlu0 %2053  ;;  %v4467_v57 = vpop.f32.mrf.mxu0  ;;  %v635_v15 = vsel %vm606_vm2, %v2983_v24, %v439_v25 }
 0x1e3   : > { %v2155_v43 = vsel %vm639_vm1, %v2123_v35, %v2054_v34  ;;  %v2988_v34 = vld [vmem:[%s3453_s19 + $0x188] sm:$0xff] }
 0x1e4   : > { %3343 = vmatprep.mubr.msk.f32.mxu0 %vm1094_vm3, %v2155_v43  ;;  %v3254_v30 = vpop.f32.mrf.mxu1 }
 0x1e5   : > { %v441_v21 = vpop.permute.xlu1 %440  ;;  %v1591_v51 = vadd.f32 %v3254_v30, %v4367_v4 }
 0x1e6   : > { %v2056_v12 = vpop.permute.xlu0 %2055  ;;  %v636_v3 = vsel %vm606_vm2, %v2984_v18, %v441_v21  ;;  %v1585_v17 = vpop.f32.mrf.mxu1  ;;  %v4478_v18 = vld [vmem:[%s4616_s2] ss:$0 sm:$0xff] }
 0x1e7   : > { %v2156_v0 = vsel %vm639_vm1, %v2124_v52, %v2056_v12  ;;  %v1586_v36 = vadd.f32 %v1585_v17, %v4374_v6 }
 0x1e8   : > { %3344 = vmatmul.mubr.msk.f32.gmra.mxu0 %vm1094_vm3, %v2156_v0 }
 0x1e9   : > { %v569_v8 = vpop.permute.xlu1 %568 }
 0x1ea   : > { %v669_v63 = vsel %vm639_vm1, %v636_v3, %v569_v8  ;;  %v567_v9 = vpop.permute.xlu0 %566 }
 0x1eb   : > { %v668_v50 = vsel %vm639_vm1, %v635_v15, %v567_v9 }
 0x1ec   : > { %3294 = vmatprep.mubr.msk.f32.mxu1 %vm1094_vm3, %v668_v50  ;;  %v3306_v16 = vpop.f32.mrf.mxu0 }
 0x1ed   : > { %v2489_v24 = vadd.f32 %v3306_v16, %v1591_v51  ;;  %3295 = vmatmul.mubr.msk.f32.gmra.mxu1 %vm1094_vm3, %v669_v63  ;;  %v1932_v41 = vpop.permute.xlu1 %1931 }
 0x1ee   : > { %v2329_v5 = vpop.f32.mrf.mxu0  ;;  %v1930_v26 = vpop.permute.xlu0 %1929  ;;  %v2126_v12 = vsel %vm606_vm2, %v2988_v34, %v1932_v41 }
 0x1ef   : > { %v2528_v4 = vadd.f32 %v4478_v18, %v2489_v24  ;;  %v2488_v55 = vadd.f32 %v2329_v5, %v1586_v36  ;;  %v2125_v6 = vsel %vm606_vm2, %v2987_v28, %v1930_v26 }
 0x1f0   : > { %v3257_v39 = vpop.f32.mrf.mxu1 }
 0x1f1   : > { %v2560_v48 = vmul.f32 0.1, %v2528_v4  ;;  %v2527_v42 = vadd.f32 %v4478_v18, %v2488_v55  ;;  %v443_v14 = vpop.permute.xlu1 %442  ;;  %v1601_v8 = vadd.f32 %v3257_v39, %v4379_v45  ;;  %v2990_v55 = vld [vmem:[%s3453_s19 + $0x1a0] sm:$0xff] }
 0x1f2   : > { %v2058_v25 = vpop.permute.xlu0 %2057  ;;  %v1595_v0 = vpop.f32.mrf.mxu1  ;;  %v637_v16 = vsel %vm606_vm2, %v4449_v46, %v443_v14  ;;  %v2989_v14 = vld [vmem:[%s3453_s19 + $0x198] sm:$0xff] }
 0x1f3   : > { %v2592_v35 = vmax.f32 %v2528_v4, %v2560_v48  ;;  %v2559_v43 = vmul.f32 0.1, %v2527_v42  ;;  %v2157_v21 = vsel %vm639_vm1, %v2125_v6, %v2058_v25  ;;  %v1596_v63 = vadd.f32 %v1595_v0, %v4387_v58 }
 0x1f4   : > { %3346 = vmatprep.mubr.msk.f32.mxu0 %vm1094_vm3, %v2157_v21 }
 0x1f5   : > { %2624 = vst [vmem:[%s4489_s16 + $0x8] sm:$0xff] %v2592_v35  ;;  %v2591_v52 = vmax.f32 %v2527_v42, %v2559_v43  ;;  %v445_v30 = vpop.permute.xlu1 %444 }
 0x1f6   : > { %v2060_v3 = vpop.permute.xlu0 %2059  ;;  %v638_v9 = vsel %vm606_vm2, %v2986_v10, %v445_v30 }
 0x1f7   : > { %2623 = vst [vmem:[%s4489_s16] sm:$0xff] %v2591_v52  ;;  %v2158_v15 = vsel %vm639_vm1, %v2126_v12, %v2060_v3 }
 0x1f8   : > { %v3309_v17 = vpop.f32.mrf.mxu0  ;;  %3347 = vmatmul.mubr.msk.f32.gmra.mxu0 %vm1094_vm3, %v2158_v15 }
 0x1f9   : > { %v2491_v51 = vadd.f32 %v3309_v17, %v1601_v8  ;;  %v573_v50 = vpop.permute.xlu1 %572 }
 0x1fa   : > { %v671_v36 = vsel %vm639_vm1, %v638_v9, %v573_v50  ;;  %v2339_v24 = vpop.f32.mrf.mxu0  ;;  %v571_v45 = vpop.permute.xlu0 %570 }
 0x1fb   : > { %v2530_v41 = vadd.f32 %v4478_v18, %v2491_v51  ;;  %v2490_v5 = vadd.f32 %v2339_v24, %v1596_v63  ;;  %v670_v26 = vsel %vm639_vm1, %v637_v16, %v571_v45 }
 0x1fc   : > { %3297 = vmatprep.mubr.msk.f32.mxu1 %vm1094_vm3, %v670_v26  ;;  %v3260_v4 = vpop.f32.mrf.mxu1 }
 0x1fd   : > { %v2562_v58 = vmul.f32 0.1, %v2530_v41  ;;  %v2529_v10 = vadd.f32 %v4478_v18, %v2490_v5  ;;  %3298 = vmatmul.mubr.msk.f32.gmra.mxu1 %vm1094_vm3, %v671_v36  ;;  %v1936_v46 = vpop.permute.xlu1 %1935  ;;  %v1611_v52 = vadd.f32 %v3260_v4, %v4392_v2 }
 0x1fe   : > { %v1934_v28 = vpop.permute.xlu0 %1933  ;;  %v2128_v39 = vsel %vm606_vm2, %v2990_v55, %v1936_v46  ;;  %v1605_v34 = vpop.f32.mrf.mxu1 }
 0x1ff   : > { %v2594_v48 = vmax.f32 %v2530_v41, %v2562_v58  ;;  %v2561_v42 = vmul.f32 0.1, %v2529_v10  ;;  %v2127_v35 = vsel %vm606_vm2, %v2989_v14, %v1934_v28  ;;  %v1606_v0 = vadd.f32 %v1605_v34, %v4401_v22 }
 0x201   : > { %2626 = vst [vmem:[%s4489_s16 + $0x18] sm:$0xff] %v2594_v48  ;;  %v2593_v6 = vmax.f32 %v2529_v10, %v2561_v42  ;;  %v2064_v25 = vpop.permute.xlu1 %2063 }
 0x202   : > { %v2160_v43 = vsel %vm639_vm1, %v2128_v39, %v2064_v25  ;;  %v2062_v21 = vpop.permute.xlu0 %2061 }
 0x203   : > { %2625 = vst [vmem:[%s4489_s16 + $0x10] sm:$0xff] %v2593_v6  ;;  %v2159_v30 = vsel %vm639_vm1, %v2127_v35, %v2062_v21 }
 0x204   : > { %v3312_v12 = vpop.f32.mrf.mxu0  ;;  %3349 = vmatprep.mubr.msk.f32.mxu0 %vm1094_vm3, %v2159_v30 }
 0x205   : > { %v2493_v3 = vadd.f32 %v3312_v12, %v1611_v52  ;;  %3350 = vmatmul.mubr.msk.f32.gmra.mxu0 %vm1094_vm3, %v2160_v43 }
 0x206   : > { %v2349_v8 = vpop.f32.mrf.mxu0 }
 0x207   : > { %v2532_v15 = vadd.f32 %v4478_v18, %v2493_v3  ;;  %v2492_v17 = vadd.f32 %v2349_v8, %v1606_v0 }
 0x208   : > { %v3263_v51 = vpop.f32.mrf.mxu1 }
 0x209   : > { %v2564_v63 = vmul.f32 0.1, %v2532_v15  ;;  %v2531_v9 = vadd.f32 %v4478_v18, %v2492_v17  ;;  %v1621_v22 = vadd.f32 %v3263_v51, %v4407_v37 }
 0x20a   : > { %v1615_v36 = vpop.f32.mrf.mxu1 }
 0x20b   : > { %v2596_v2 = vmax.f32 %v2532_v15, %v2564_v63  ;;  %v2563_v50 = vmul.f32 0.1, %v2531_v9  ;;  %v1616_v45 = vadd.f32 %v1615_v36, %v4413_v1 }
 0x20d   : > { %2628 = vst [vmem:[%s4489_s16 + $0x28] sm:$0xff] %v2596_v2  ;;  %v2595_v16 = vmax.f32 %v2531_v9, %v2563_v50 }
 0x20f   : > { %2627 = vst [vmem:[%s4489_s16 + $0x20] sm:$0xff] %v2595_v16 }
 0x210   : > { %v3315_v24 = vpop.f32.mrf.mxu0 }
 0x211   : > { %v2495_v41 = vadd.f32 %v3315_v24, %v1621_v22 }
 0x212   : > { %v2359_v5 = vpop.f32.mrf.mxu0 }
 0x213   : > { %v2534_v26 = vadd.f32 %v4478_v18, %v2495_v41  ;;  %v2494_v58 = vadd.f32 %v2359_v5, %v1616_v45 }
 0x214   : > { %v3266_v4 = vpop.f32.mrf.mxu1 }
 0x215   : > { %v2566_v10 = vmul.f32 0.1, %v2534_v26  ;;  %v2533_v46 = vadd.f32 %v4478_v18, %v2494_v58  ;;  %v1631_v37 = vadd.f32 %v3266_v4, %v4418_v20 }
 0x216   : > { %v1625_v42 = vpop.f32.mrf.mxu1 }
 0x217   : > { %v2598_v55 = vmax.f32 %v2534_v26, %v2566_v10  ;;  %v2565_v28 = vmul.f32 0.1, %v2533_v46  ;;  %v1626_v14 = vadd.f32 %v1625_v42, %v4426_v13 }
 0x219   : > { %2630 = vst [vmem:[%s4489_s16 + $0x38] sm:$0xff] %v2598_v55  ;;  %v2597_v48 = vmax.f32 %v2533_v46, %v2565_v28 }
 0x21b   : > { %2629 = vst [vmem:[%s4489_s16 + $0x30] sm:$0xff] %v2597_v48 }
 0x21c   : > { %v3318_v1 = vpop.f32.mrf.mxu0 }
 0x21d   : > { %v2497_v6 = vadd.f32 %v3318_v1, %v1631_v37 }
 0x21e   : > { %v2369_v39 = vpop.f32.mrf.mxu0 }
 0x21f   : > { %v2536_v25 = vadd.f32 %v4478_v18, %v2497_v6  ;;  %v2496_v35 = vadd.f32 %v2369_v39, %v1626_v14 }
 0x220   : > { %v3269_v21 = vpop.f32.mrf.mxu1 }
 0x221   : > { %v2568_v34 = vmul.f32 0.1, %v2536_v25  ;;  %v2535_v43 = vadd.f32 %v4478_v18, %v2496_v35  ;;  %v1641_v20 = vadd.f32 %v3269_v21, %v4432_v29 }
 0x222   : > { %v1635_v0 = vpop.f32.mrf.mxu1 }
 0x223   : > { %v2600_v52 = vmax.f32 %v2536_v25, %v2568_v34  ;;  %v2567_v30 = vmul.f32 0.1, %v2535_v43  ;;  %v1636_v3 = vadd.f32 %v1635_v0, %v4441_v54 }
 0x225   : > { %2632 = vst [vmem:[%s4489_s16 + $0x48] sm:$0xff] %v2600_v52  ;;  %v2599_v12 = vmax.f32 %v2535_v43, %v2567_v30 }
 0x227   : > { %2631 = vst [vmem:[%s4489_s16 + $0x40] sm:$0xff] %v2599_v12 }
 0x228   : > { %v3321_v13 = vpop.f32.mrf.mxu0 }
 0x229   : > { %v2499_v8 = vadd.f32 %v3321_v13, %v1641_v20 }
 0x22a   : > { %v2379_v15 = vpop.f32.mrf.mxu0 }
 0x22b   : > { %v2538_v17 = vadd.f32 %v4478_v18, %v2499_v8  ;;  %v2498_v63 = vadd.f32 %v2379_v15, %v1636_v3 }
 0x22d   : > { %v2570_v9 = vmul.f32 0.1, %v2538_v17  ;;  %v2537_v51 = vadd.f32 %v4478_v18, %v2498_v63  ;;  %v3272_v36 = vpop.f32.mrf.mxu1 }
 0x22e   : > { %v1651_v22 = vadd.f32 %v3272_v36, %v4446_v33 }
 0x22f   : > { %v2602_v2 = vmax.f32 %v2538_v17, %v2570_v9  ;;  %v2569_v50 = vmul.f32 0.1, %v2537_v51  ;;  %v1645_v29 = vpop.f32.mrf.mxu1 }
 0x230   : > { %v1646_v24 = vadd.f32 %v1645_v29, %v4455_v62 }
 0x231   : > { %2634 = vst [vmem:[%s4489_s16 + $0x58] sm:$0xff] %v2602_v2  ;;  %v2601_v16 = vmax.f32 %v2537_v51, %v2569_v50 }
 0x233   : > { %2633 = vst [vmem:[%s4489_s16 + $0x50] sm:$0xff] %v2601_v16 }
 0x238   : > { %v3324_v54 = vpop.f32.mrf.mxu0 }
 0x239   : > { %v2501_v45 = vadd.f32 %v3324_v54, %v1651_v22 }
 0x23a   : > { %v2389_v41 = vpop.f32.mrf.mxu0 }
 0x23b   : > { %v2540_v5 = vadd.f32 %v4478_v18, %v2501_v45  ;;  %v2500_v26 = vadd.f32 %v2389_v41, %v1646_v24 }
 0x23d   : > { %v2572_v58 = vmul.f32 0.1, %v2540_v5  ;;  %v2539_v10 = vadd.f32 %v4478_v18, %v2500_v26  ;;  %v3275_v28 = vpop.f32.mrf.mxu1 }
 0x23e   : > { %v1661_v48 = vadd.f32 %v3275_v28, %v4462_v44 }
 0x23f   : > { %v2604_v46 = vmax.f32 %v2540_v5, %v2572_v58  ;;  %v2571_v4 = vmul.f32 0.1, %v2539_v10  ;;  %v1655_v33 = vpop.f32.mrf.mxu1 }
 0x240   : > { %v1656_v42 = vadd.f32 %v1655_v33, %v4467_v57 }
 0x241   : > { %2636 = vst [vmem:[%s4489_s16 + $0x68] sm:$0xff] %v2604_v46  ;;  %v2603_v55 = vmax.f32 %v2539_v10, %v2571_v4 }
 0x243   : > { %2635 = vst [vmem:[%s4489_s16 + $0x60] sm:$0xff] %v2603_v55 }
 0x248   : > { %v3327_v62 = vpop.f32.mrf.mxu0 }
 0x249   : > { %v2503_v37 = vadd.f32 %v3327_v62, %v1661_v48 }
 0x24a   : > { %v2399_v1 = vpop.f32.mrf.mxu0 }
 0x24b   : > { %v2542_v14 = vadd.f32 %v4478_v18, %v2503_v37  ;;  %v2502_v6 = vadd.f32 %v2399_v1, %v1656_v42 }
 0x24d   : > { %v2574_v39 = vmul.f32 0.1, %v2542_v14  ;;  %v2541_v25 = vadd.f32 %v4478_v18, %v2502_v6  ;;  %v3278_v21 = vpop.f32.mrf.mxu1 }
 0x24e   : > { %v1671_v52 = vadd.f32 %v3278_v21, %v4357_v38 }
 0x24f   : > { %v2606_v35 = vmax.f32 %v2542_v14, %v2574_v39  ;;  %v2573_v34 = vmul.f32 0.1, %v2541_v25  ;;  %v1665_v44 = vpop.f32.mrf.mxu1 }
 0x250   : > { %v1666_v30 = vadd.f32 %v1665_v44, %v4363_v53 }
 0x251   : > { %2638 = vst [vmem:[%s4489_s16 + $0x78] sm:$0xff] %v2606_v35  ;;  %v2605_v43 = vmax.f32 %v2541_v25, %v2573_v34 }
 0x253   : > { %2637 = vst [vmem:[%s4489_s16 + $0x70] sm:$0xff] %v2605_v43 }
 0x258   : > { %v3330_v57 = vpop.f32.mrf.mxu0 }
 0x259   : > { %v2505_v12 = vadd.f32 %v3330_v57, %v1671_v52 }
 0x25a   : > { %v2409_v0 = vpop.f32.mrf.mxu0 }
 0x25b   : > { %v2544_v20 = vadd.f32 %v4478_v18, %v2505_v12  ;;  %v2504_v13 = vadd.f32 %v2409_v0, %v1666_v30 }
 0x25d   : > { %v2576_v3 = vmul.f32 0.1, %v2544_v20  ;;  %v2543_v8 = vadd.f32 %v4478_v18, %v2504_v13  ;;  %v3281_v9 = vpop.f32.mrf.mxu1 }
 0x25e   : > { %v1681_v51 = vadd.f32 %v3281_v9, %v4370_v60 }
 0x25f   : > { %v2608_v15 = vmax.f32 %v2544_v20, %v2576_v3  ;;  %v2575_v17 = vmul.f32 0.1, %v2543_v8  ;;  %v1675_v38 = vpop.f32.mrf.mxu1 }
 0x260   : > { %v1676_v2 = vadd.f32 %v1675_v38, %v4377_v32 }
 0x261   : > { %2640 = vst [vmem:[%s4489_s16 + $0x88] sm:$0xff] %v2608_v15  ;;  %v2607_v63 = vmax.f32 %v2543_v8, %v2575_v17 }
 0x263   : > { %2639 = vst [vmem:[%s4489_s16 + $0x80] sm:$0xff] %v2607_v63 }
 0x268   : > { %v3333_v53 = vpop.f32.mrf.mxu0 }
 0x269   : > { %v2507_v50 = vadd.f32 %v3333_v53, %v1681_v51 }
 0x26a   : > { %v2419_v16 = vpop.f32.mrf.mxu0 }
 0x26b   : > { %v2546_v36 = vadd.f32 %v4478_v18, %v2507_v50  ;;  %v2506_v29 = vadd.f32 %v2419_v16, %v1676_v2 }
 0x26d   : > { %v2578_v22 = vmul.f32 0.1, %v2546_v36  ;;  %v2545_v54 = vadd.f32 %v4478_v18, %v2506_v29  ;;  %v3284_v5 = vpop.f32.mrf.mxu1 }
 0x26e   : > { %v1691_v26 = vadd.f32 %v3284_v5, %v4381_v61 }
 0x26f   : > { %v2610_v24 = vmax.f32 %v2546_v36, %v2578_v22  ;;  %v2577_v45 = vmul.f32 0.1, %v2545_v54  ;;  %v1685_v60 = vpop.f32.mrf.mxu1 }
 0x270   : > { %v1686_v58 = vadd.f32 %v1685_v60, %v4389_v59 }
 0x271   : > { %2642 = vst [vmem:[%s4489_s16 + $0x98] sm:$0xff] %v2610_v24  ;;  %v2609_v41 = vmax.f32 %v2545_v54, %v2577_v45 }
 0x273   : > { %2641 = vst [vmem:[%s4489_s16 + $0x90] sm:$0xff] %v2609_v41 }
 0x278   : > { %v3336_v32 = vpop.f32.mrf.mxu0 }
 0x279   : > { %v2509_v10 = vadd.f32 %v3336_v32, %v1691_v26 }
 0x27a   : > { %v2429_v46 = vpop.f32.mrf.mxu0 }
 0x27b   : > { %v2548_v4 = vadd.f32 %v4478_v18, %v2509_v10  ;;  %v2508_v55 = vadd.f32 %v2429_v46, %v1686_v58 }
 0x27d   : > { %v2580_v28 = vmul.f32 0.1, %v2548_v4  ;;  %v2547_v33 = vadd.f32 %v4478_v18, %v2508_v55  ;;  %v3287_v37 = vpop.f32.mrf.mxu1 }
 0x27e   : > { %v1701_v1 = vadd.f32 %v3287_v37, %v4395_v23 }
 0x27f   : > { %v2612_v48 = vmax.f32 %v2548_v4, %v2580_v28  ;;  %v2579_v62 = vmul.f32 0.1, %v2547_v33  ;;  %v1695_v61 = vpop.f32.mrf.mxu1 }
 0x280   : > { %v1696_v14 = vadd.f32 %v1695_v61, %v4404_v40 }
 0x281   : > { %2644 = vst [vmem:[%s4489_s16 + $0xa8] sm:$0xff] %v2612_v48  ;;  %v2611_v42 = vmax.f32 %v2547_v33, %v2579_v62 }
 0x283   : > { %2643 = vst [vmem:[%s4489_s16 + $0xa0] sm:$0xff] %v2611_v42 }
 0x288   : > { %v3339_v59 = vpop.f32.mrf.mxu0 }
 0x289   : > { %v2511_v6 = vadd.f32 %v3339_v59, %v1701_v1 }
 0x28a   : > { %v2439_v39 = vpop.f32.mrf.mxu0 }
 0x28b   : > { %v2550_v25 = vadd.f32 %v4478_v18, %v2511_v6  ;;  %v2510_v35 = vadd.f32 %v2439_v39, %v1696_v14 }
 0x28d   : > { %v2582_v34 = vmul.f32 0.1, %v2550_v25  ;;  %v2549_v43 = vadd.f32 %v4478_v18, %v2510_v35  ;;  %v3290_v57 = vpop.f32.mrf.mxu1 }
 0x28e   : > { %v1711_v30 = vadd.f32 %v3290_v57, %v4410_v56 }
 0x28f   : > { %v2614_v21 = vmax.f32 %v2550_v25, %v2582_v34  ;;  %v2581_v44 = vmul.f32 0.1, %v2549_v43  ;;  %v1705_v23 = vpop.f32.mrf.mxu1 }
 0x290   : > { %v1706_v12 = vadd.f32 %v1705_v23, %v4415_v7 }
 0x291   : > { %2646 = vst [vmem:[%s4489_s16 + $0xb8] sm:$0xff] %v2614_v21  ;;  %v2613_v52 = vmax.f32 %v2549_v43, %v2581_v44 }
 0x293   : > { %2645 = vst [vmem:[%s4489_s16 + $0xb0] sm:$0xff] %v2613_v52 }
 0x298   : > { %v3342_v40 = vpop.f32.mrf.mxu0 }
 0x299   : > { %v2513_v0 = vadd.f32 %v3342_v40, %v1711_v30 }
 0x29a   : > { %v2449_v20 = vpop.f32.mrf.mxu0 }
 0x29b   : > { %v2552_v13 = vadd.f32 %v4478_v18, %v2513_v0  ;;  %v2512_v3 = vadd.f32 %v2449_v20, %v1706_v12 }
 0x29d   : > { %v2584_v8 = vmul.f32 0.1, %v2552_v13  ;;  %v2551_v15 = vadd.f32 %v4478_v18, %v2512_v3  ;;  %v3293_v38 = vpop.f32.mrf.mxu1 }
 0x29e   : > { %v1721_v51 = vadd.f32 %v3293_v38, %v4422_v47 }
 0x29f   : > { %v2616_v17 = vmax.f32 %v2552_v13, %v2584_v8  ;;  %v2583_v63 = vmul.f32 0.1, %v2551_v15  ;;  %v1715_v56 = vpop.f32.mrf.mxu1 }
 0x2a0   : > { %v1716_v53 = vadd.f32 %v1715_v56, %v4429_v27 }
 0x2a1   : > { %2648 = vst [vmem:[%s4489_s16 + $0xc8] sm:$0xff] %v2616_v17  ;;  %v2615_v9 = vmax.f32 %v2551_v15, %v2583_v63 }
 0x2a3   : > { %2647 = vst [vmem:[%s4489_s16 + $0xc0] sm:$0xff] %v2615_v9 }
 0x2a8   : > { %v3345_v7 = vpop.f32.mrf.mxu0 }
 0x2a9   : > { %v2515_v2 = vadd.f32 %v3345_v7, %v1721_v51 }
 0x2aa   : > { %v2459_v50 = vpop.f32.mrf.mxu0 }
 0x2ab   : > { %v2554_v16 = vadd.f32 %v4478_v18, %v2515_v2  ;;  %v2514_v36 = vadd.f32 %v2459_v50, %v1716_v53 }
 0x2ad   : > { %v2586_v29 = vmul.f32 0.1, %v2554_v16  ;;  %v2553_v22 = vadd.f32 %v4478_v18, %v2514_v36  ;;  %v3296_v41 = vpop.f32.mrf.mxu1 }
 0x2ae   : > { %v1731_v5 = vadd.f32 %v3296_v41, %v4435_v49 }
 0x2af   : > { %v2618_v54 = vmax.f32 %v2554_v16, %v2586_v29  ;;  %v2585_v24 = vmul.f32 0.1, %v2553_v22  ;;  %v1725_v47 = vpop.f32.mrf.mxu1 }
 0x2b0   : > { %v1726_v60 = vadd.f32 %v1725_v47, %v4444_v31 }
 0x2b1   : > { %2650 = vst [vmem:[%s4489_s16 + $0xd8] sm:$0xff] %v2618_v54  ;;  %v2617_v45 = vmax.f32 %v2553_v22, %v2585_v24 }
 0x2b3   : > { %2649 = vst [vmem:[%s4489_s16 + $0xd0] sm:$0xff] %v2617_v45 }
 0x2b8   : > { %v3348_v27 = vpop.f32.mrf.mxu0 }
 0x2b9   : > { %v2517_v26 = vadd.f32 %v3348_v27, %v1731_v5 }
 0x2ba   : > { %v2469_v32 = vpop.f32.mrf.mxu0 }
 0x2bb   : > { %v2556_v58 = vadd.f32 %v4478_v18, %v2517_v26  ;;  %v2516_v10 = vadd.f32 %v2469_v32, %v1726_v60 }
 0x2bd   : > { %v2588_v46 = vmul.f32 0.1, %v2556_v58  ;;  %v2555_v4 = vadd.f32 %v4478_v18, %v2516_v10  ;;  %v3299_v33 = vpop.f32.mrf.mxu1 }
 0x2be   : > { %v1741_v62 = vadd.f32 %v3299_v33, %v4451_v11 }
 0x2bf   : > { %v2620_v55 = vmax.f32 %v2556_v58, %v2588_v46  ;;  %v2587_v28 = vmul.f32 0.1, %v2555_v4  ;;  %v1735_v49 = vpop.f32.mrf.mxu1 }
 0x2c0   : > { %v1736_v42 = vadd.f32 %v1735_v49, %v4459_v19 }
 0x2c1   : > { %2652 = vst [vmem:[%s4489_s16 + $0xe8] sm:$0xff] %v2620_v55  ;;  %v2619_v48 = vmax.f32 %v2555_v4, %v2587_v28 }
 0x2c3   : > { %2651 = vst [vmem:[%s4489_s16 + $0xe0] sm:$0xff] %v2619_v48 }
 0x2c5   : > { %v3351_v31 = vpop.f32.mrf.mxu0 }
 0x2c6   : > { %v2519_v37 = vadd.f32 %v3351_v31, %v1741_v62 }
 0x2c7   : > { %v2479_v61 = vpop.f32.mrf.mxu0 }
 0x2c8   : > { %v2558_v1 = vadd.f32 %v4478_v18, %v2519_v37  ;;  %v2518_v59 = vadd.f32 %v2479_v61, %v1736_v42 }
 0x2ca   : > { %v2590_v14 = vmul.f32 0.1, %v2558_v1  ;;  %v2557_v6 = vadd.f32 %v4478_v18, %v2518_v59 }
 0x2cc   : > { %v2622_v39 = vmax.f32 %v2558_v1, %v2590_v14  ;;  %v2589_v25 = vmul.f32 0.1, %v2557_v6 }
 0x2ce   : > { %2654 = vst [vmem:[%s4489_s16 + $0xf8] sm:$0xff] %v2622_v39  ;;  %v2621_v35 = vmax.f32 %v2557_v6, %v2589_v25 }
 0x2d0   : > { %2653 = vst [vmem:[%s4489_s16 + $0xf0] sm:$0xff] %v2621_v35 }
 0x2d1 PF: > { %s13_s14 = sadd.s32 1, %s3405_s14   ;;  %s4626_s12 = smov %s3401_s13 }
 0x2d2   : > { %p10_p5 = scmp.ge.s32.totalorder %s13_s14, 4   ;;  %s4627_s13 = smov %s4629_s15 }
 0x2d4   :  { %12 = sbr.rel (!%p10_p5) target bundleno = 2 (0x2), region = 72 }

</bundles_post_ra>
